<compile_context>
chip_gen: v6e
topology: v6e:2x2x1
jax: 0.10.0
libtpu: 0.0.40
codegen_flags: <defaults>
</compile_context>

<pallas_src>
import jax
import jax.numpy as jnp
from jax.experimental import pallas as pl
from jax.experimental.pallas import tpu as pltpu

IN_DIM = 32 * 32 * 3      # 3072
HID = 200
HID_PAD = 256             # padded hidden (multiple of 128)
OUT = 10
OUT_PAD = 128             # padded output (lane-dense stores)


def _round_up(x, m):
    return ((x + m - 1) // m) * m


def relunet2_kernel(x_ref, w1_ref, b1_ref, w2_ref, b2_ref, w3_ref, b3_ref, o_ref):
    # fc1 + ReLU  (bf16 operands, f32 accumulation)
    h1 = jnp.dot(x_ref[...], w1_ref[...], preferred_element_type=jnp.float32)
    h1 = jnp.maximum(h1 + b1_ref[...], 0.0)
    # fc2 + ReLU
    h2 = jnp.dot(h1.astype(jnp.bfloat16), w2_ref[...],
                 preferred_element_type=jnp.float32)
    h2 = jnp.maximum(h2 + b2_ref[...], 0.0)
    # fc3 (no activation), lane-dense 128-wide store
    out = jnp.dot(h2.astype(jnp.bfloat16), w3_ref[...],
                  preferred_element_type=jnp.float32)
    o_ref[...] = (out + b3_ref[...]).astype(o_ref.dtype)


def _prepare_params(params):
    """Pad hidden 200->256 and out 10->128 with zeros; weights -> bf16, biases -> f32."""
    w1, b1, w2, b2, w3, b3 = params
    w1p = jnp.zeros((IN_DIM, HID_PAD), jnp.bfloat16).at[:, :HID].set(w1.astype(jnp.bfloat16))
    b1p = jnp.zeros((1, HID_PAD), jnp.float32).at[:, :HID].set(b1.astype(jnp.float32))
    w2p = jnp.zeros((HID_PAD, HID_PAD), jnp.bfloat16).at[:HID, :HID].set(w2.astype(jnp.bfloat16))
    b2p = jnp.zeros((1, HID_PAD), jnp.float32).at[:, :HID].set(b2.astype(jnp.float32))
    w3p = jnp.zeros((HID_PAD, OUT_PAD), jnp.bfloat16).at[:HID, :OUT].set(w3.astype(jnp.bfloat16))
    b3p = jnp.zeros((1, OUT_PAD), jnp.float32).at[:, :OUT].set(b3.astype(jnp.float32))
    return w1p, b1p, w2p, b2p, w3p, b3p


def relunet2_forward(x_nchw, params):
    B = x_nchw.shape[0]
    x_flat = x_nchw.reshape(B, -1).astype(jnp.bfloat16)   # same order as torch .view

    # Batch tile: multiple of 8, capped at 256; pad B up to a whole number of tiles.
    TM = min(256, _round_up(B, 8))
    B_pad = _round_up(B, TM)
    if B_pad != B:
        x_flat = jnp.pad(x_flat, ((0, B_pad - B), (0, 0)))

    w1p, b1p, w2p, b2p, w3p, b3p = _prepare_params(params)

    grid = (pl.cdiv(B_pad, TM),)

    flops = 2 * B_pad * (IN_DIM * HID_PAD + HID_PAD * HID_PAD + HID_PAD * OUT_PAD)
    bytes_accessed = (
        B_pad * IN_DIM * 2                                   # x tile (bf16)
        + (IN_DIM * HID_PAD + HID_PAD * HID_PAD + HID_PAD * OUT_PAD) * 2  # weights bf16
        + (2 * HID_PAD + OUT_PAD) * 4                        # biases f32
        + B_pad * OUT_PAD * 4                                # output f32
    )

    out_padded = pl.pallas_call(
        relunet2_kernel,
        out_shape=jax.ShapeDtypeStruct((B_pad, OUT_PAD), jnp.float32),
        grid=grid,
        in_specs=[
            pl.BlockSpec((TM, IN_DIM), lambda i: (i, 0)),        # x tile (pipelined)
            pl.BlockSpec((IN_DIM, HID_PAD), lambda i: (0, 0)),   # w1 (resident)
            pl.BlockSpec((1, HID_PAD), lambda i: (0, 0)),        # b1
            pl.BlockSpec((HID_PAD, HID_PAD), lambda i: (0, 0)),  # w2
            pl.BlockSpec((1, HID_PAD), lambda i: (0, 0)),        # b2
            pl.BlockSpec((HID_PAD, OUT_PAD), lambda i: (0, 0)),  # w3
            pl.BlockSpec((1, OUT_PAD), lambda i: (0, 0)),        # b3
        ],
        out_specs=pl.BlockSpec((TM, OUT_PAD), lambda i: (i, 0)),
        compiler_params=pltpu.CompilerParams(
            dimension_semantics=("parallel",)),
        cost_estimate=pl.CostEstimate(
            flops=flops, transcendentals=0, bytes_accessed=bytes_accessed),
    )(x_flat, w1p, b1p, w2p, b2p, w3p, b3p)

    return out_padded[:B, :OUT]


def init_params(key):
    """Deterministic init matching nn.Linear shapes (stored as (in, out))."""
    def linear(k, fan_in, fan_out):
        k_w, k_b = jax.random.split(k)
        bound = 1.0 / jnp.sqrt(fan_in)
        w = jax.random.uniform(k_w, (fan_in, fan_out), jnp.float32, -bound, bound)
        b = jax.random.uniform(k_b, (1, fan_out), jnp.float32, -bound, bound)
        return w, b

    k1, k2, k3 = jax.random.split(key, 3)
    w1, b1 = linear(k1, IN_DIM, HID)
    w2, b2 = linear(k2, HID, HID)
    w3, b3 = linear(k3, HID, OUT)
    return (w1, b1, w2, b2, w3, b3)


def reference_forward(x_nchw, params):
    """JAX reference with the same bf16-operand / f32-accumulate recipe as the kernel."""
    w1, b1, w2, b2, w3, b3 = params
    x = x_nchw.reshape(x_nchw.shape[0], -1)

    def lin(h, w, b):
        return jnp.dot(h.astype(jnp.bfloat16), w.astype(jnp.bfloat16),
                       preferred_element_type=jnp.float32) + b

    h1 = jnp.maximum(lin(x, w1, b1), 0.0)
    h2 = jnp.maximum(lin(h1, w2, b2), 0.0)
    return lin(h2, w3, b3)


if __name__ == "__main__":
    key = jax.random.PRNGKey(0)
    k_param, k_x = jax.random.split(key)

    params = init_params(k_param)
    # CIFAR-like input implied by fc1: (B, 3, 32, 32) NCHW
    x = jax.random.normal(k_x, (2, 3, 32, 32), dtype=jnp.float32)

    out = relunet2_forward(x, params)
    out = jax.block_until_ready(out)

    ref = reference_forward(x, params)
    assert out.shape == (2, OUT)
    assert jnp.allclose(out, ref, atol=1e-2, rtol=1e-2), "mismatch vs JAX reference"

    print("KERNEL_OK")
</pallas_src>

<mosaic_0001>
module attributes {stable_mosaic.version = 11 : i64} {
  func.func @relunet2_kernel(%arg0: i32, %arg1: memref<8x3072xbf16, #tpu.memory_space<vmem>>, %arg2: memref<3072x256xbf16, #tpu.memory_space<vmem>>, %arg3: memref<1x256xf32, #tpu.memory_space<vmem>>, %arg4: memref<256x256xbf16, #tpu.memory_space<vmem>>, %arg5: memref<1x256xf32, #tpu.memory_space<vmem>>, %arg6: memref<256x128xbf16, #tpu.memory_space<vmem>>, %arg7: memref<1x128xf32, #tpu.memory_space<vmem>>, %arg8: memref<8x128xf32, #tpu.memory_space<vmem>>) attributes {dimension_semantics = [#tpu.dimension_semantics<parallel>], iteration_bounds = array<i64: 1>, scalar_prefetch = 0 : i64, scratch_operands = 0 : i64, tpu.core_type = #tpu.core_type<tc>, window_params = [{transform_indices = @transform_0, window_bounds = array<i64: 8, 3072>}, {pipeline_mode = #tpu.pipeline_mode<synchronous>, transform_indices = @transform_1, window_bounds = array<i64: 3072, 256>}, {pipeline_mode = #tpu.pipeline_mode<synchronous>, transform_indices = @transform_2, window_bounds = array<i64: 1, 256>}, {pipeline_mode = #tpu.pipeline_mode<synchronous>, transform_indices = @transform_3, window_bounds = array<i64: 256, 256>}, {pipeline_mode = #tpu.pipeline_mode<synchronous>, transform_indices = @transform_4, window_bounds = array<i64: 1, 256>}, {pipeline_mode = #tpu.pipeline_mode<synchronous>, transform_indices = @transform_5, window_bounds = array<i64: 256, 128>}, {pipeline_mode = #tpu.pipeline_mode<synchronous>, transform_indices = @transform_6, window_bounds = array<i64: 1, 128>}, {transform_indices = @transform_7, window_bounds = array<i64: 8, 128>}]} {
    %c0 = arith.constant 0 : index
    %c0_0 = arith.constant 0 : index
    %0 = vector.load %arg1[%c0, %c0_0] : memref<8x3072xbf16, #tpu.memory_space<vmem>>, vector<8x3072xbf16>
    %c0_1 = arith.constant 0 : index
    %c0_2 = arith.constant 0 : index
    %1 = vector.load %arg2[%c0_1, %c0_2] : memref<3072x256xbf16, #tpu.memory_space<vmem>>, vector<3072x256xbf16>
    %cst = arith.constant dense<0.000000e+00> : vector<8x256xf32>
    %2 = tpu.matmul %0, %1, %cst {dimension_numbers = #tpu.dot_dimension_numbers<[1], [0], [0], [1], [0, 0, 1, 1], [], []>} : vector<8x3072xbf16>, vector<3072x256xbf16>, vector<8x256xf32> -> vector<8x256xf32>
    %c0_3 = arith.constant 0 : index
    %c0_4 = arith.constant 0 : index
    %3 = vector.load %arg3[%c0_3, %c0_4] : memref<1x256xf32, #tpu.memory_space<vmem>>, vector<1x256xf32>
    %4 = vector.broadcast %3 : vector<1x256xf32> to vector<8x256xf32>
    %5 = arith.addf %2, %4 : vector<8x256xf32>
    %cst_5 = arith.constant 0.000000e+00 : f32
    %6 = vector.broadcast %cst_5 : f32 to vector<8x256xf32>
    %7 = arith.maximumf %5, %6 : vector<8x256xf32>
    %8 = arith.truncf %7 : vector<8x256xf32> to vector<8x256xbf16>
    %c0_6 = arith.constant 0 : index
    %c0_7 = arith.constant 0 : index
    %9 = vector.load %arg4[%c0_6, %c0_7] : memref<256x256xbf16, #tpu.memory_space<vmem>>, vector<256x256xbf16>
    %cst_8 = arith.constant dense<0.000000e+00> : vector<8x256xf32>
    %10 = tpu.matmul %8, %9, %cst_8 {dimension_numbers = #tpu.dot_dimension_numbers<[1], [0], [0], [1], [0, 0, 1, 1], [], []>} : vector<8x256xbf16>, vector<256x256xbf16>, vector<8x256xf32> -> vector<8x256xf32>
    %c0_9 = arith.constant 0 : index
    %c0_10 = arith.constant 0 : index
    %11 = vector.load %arg5[%c0_9, %c0_10] : memref<1x256xf32, #tpu.memory_space<vmem>>, vector<1x256xf32>
    %12 = vector.broadcast %11 : vector<1x256xf32> to vector<8x256xf32>
    %13 = arith.addf %10, %12 : vector<8x256xf32>
    %cst_11 = arith.constant 0.000000e+00 : f32
    %14 = vector.broadcast %cst_11 : f32 to vector<8x256xf32>
    %15 = arith.maximumf %13, %14 : vector<8x256xf32>
    %16 = arith.truncf %15 : vector<8x256xf32> to vector<8x256xbf16>
    %c0_12 = arith.constant 0 : index
    %c0_13 = arith.constant 0 : index
    %17 = vector.load %arg6[%c0_12, %c0_13] : memref<256x128xbf16, #tpu.memory_space<vmem>>, vector<256x128xbf16>
    %cst_14 = arith.constant dense<0.000000e+00> : vector<8x128xf32>
    %18 = tpu.matmul %16, %17, %cst_14 {dimension_numbers = #tpu.dot_dimension_numbers<[1], [0], [0], [1], [0, 0, 1, 1], [], []>} : vector<8x256xbf16>, vector<256x128xbf16>, vector<8x128xf32> -> vector<8x128xf32>
    %c0_15 = arith.constant 0 : index
    %c0_16 = arith.constant 0 : index
    %19 = vector.load %arg7[%c0_15, %c0_16] : memref<1x128xf32, #tpu.memory_space<vmem>>, vector<1x128xf32>
    %20 = vector.broadcast %19 : vector<1x128xf32> to vector<8x128xf32>
    %21 = arith.addf %18, %20 : vector<8x128xf32>
    %c0_17 = arith.constant 0 : index
    %c0_18 = arith.constant 0 : index
    %22 = vector.load %arg8[%c0_17, %c0_18] : memref<8x128xf32, #tpu.memory_space<vmem>>, vector<8x128xf32>
    tpu.vector_store %arg8[%c0_17, %c0_18], %21 {strides = array<i32>} : memref<8x128xf32, #tpu.memory_space<vmem>>, vector<8x128xf32>,
    return
  }
  func.func @transform_0(%arg0: i32) -> (i32, i32) {
    %c0_i32 = arith.constant 0 : i32
    %c0_i32_0 = arith.constant 0 : i32
    return %arg0, %c0_i32 : i32, i32
  }
  func.func @transform_1(%arg0: i32) -> (i32, i32) {
    %c0_i32 = arith.constant 0 : i32
    %c0_i32_0 = arith.constant 0 : i32
    %c0_i32_1 = arith.constant 0 : i32
    return %c0_i32, %c0_i32_0 : i32, i32
  }
  func.func @transform_2(%arg0: i32) -> (i32, i32) {
    %c0_i32 = arith.constant 0 : i32
    %c0_i32_0 = arith.constant 0 : i32
    %c0_i32_1 = arith.constant 0 : i32
    return %c0_i32, %c0_i32_0 : i32, i32
  }
  func.func @transform_3(%arg0: i32) -> (i32, i32) {
    %c0_i32 = arith.constant 0 : i32
    %c0_i32_0 = arith.constant 0 : i32
    %c0_i32_1 = arith.constant 0 : i32
    return %c0_i32, %c0_i32_0 : i32, i32
  }
  func.func @transform_4(%arg0: i32) -> (i32, i32) {
    %c0_i32 = arith.constant 0 : i32
    %c0_i32_0 = arith.constant 0 : i32
    %c0_i32_1 = arith.constant 0 : i32
    return %c0_i32, %c0_i32_0 : i32, i32
  }
  func.func @transform_5(%arg0: i32) -> (i32, i32) {
    %c0_i32 = arith.constant 0 : i32
    %c0_i32_0 = arith.constant 0 : i32
    %c0_i32_1 = arith.constant 0 : i32
    return %c0_i32, %c0_i32_0 : i32, i32
  }
  func.func @transform_6(%arg0: i32) -> (i32, i32) {
    %c0_i32 = arith.constant 0 : i32
    %c0_i32_0 = arith.constant 0 : i32
    %c0_i32_1 = arith.constant 0 : i32
    return %c0_i32, %c0_i32_0 : i32, i32
  }
  func.func @transform_7(%arg0: i32) -> (i32, i32) {
    %c0_i32 = arith.constant 0 : i32
    %c0_i32_0 = arith.constant 0 : i32
    return %arg0, %c0_i32 : i32, i32
  }
}

</mosaic_0001>

<bundles_post_ra>
// kernel: tpu_custom_call.1
= control target key start
LH: loop header
LB: loop body
LE: loop exit
PB: predicated region body
PF: predicated region fallthrough
CT: control target
= control target key end

     0   :  { %12 = vsyncpa [#allocation3], 0  ;;  %s4957_s0 = inlined_call_operand.hbm [shape: bf16[8,3072], index: 0, kind: input, shape index: {}]   ;;  %s4958_s1 = inlined_call_operand.hbm [shape: bf16[3072,256], index: 1, kind: input, shape index: {}]   ;;  %s4959_s2 = inlined_call_operand.hbm [shape: f32[1,256], index: 2, kind: input, shape index: {}]   ;;  %s4960_s3 = inlined_call_operand.hbm [shape: bf16[256,256], index: 3, kind: input, shape index: {}]   ;;  %s4961_s4 = inlined_call_operand.hbm [shape: f32[1,256], index: 4, kind: input, shape index: {}]   ;;  %s4962_s5 = inlined_call_operand.hbm [shape: bf16[256,128], index: 5, kind: input, shape index: {}]   ;;  %s4963_s6 = inlined_call_operand.hbm [shape: f32[1,128], index: 6, kind: input, shape index: {}]   ;;  %s4964_s7 = inlined_call_operand.hbm [shape: f32[8,128], index: 7, kind: output, shape index: {}]  }
   0x1   :  { %13 = vsyncpa [#allocation6], 0 }
   0x2   :  { %14 = vsyncpa [#allocation9], 0 }
   0x3   :  { %15 = vsyncpa [#allocation12], 0 }
   0x4   :  { %16 = vsyncpa [#allocation4], 0  ;;  %s4791_s24 = smov [#allocation5]  }
   0x5   :  { %s32_s25 = sshll.u32 %s4791_s24, 4  ;;  %s33_s25 = int_to_ptr.vmem [resolvable:$true] %s32_s25 }
   0x6   :  { %s4629_s26 = scalar_lea.vmem %s33_s25, 49152  ;;  %p4634_p1 = scmp.lt.s32.totalorder %s33_s25, %s33_s25 }
   0x7   :  { %p4630_p0 = scmp.ne.s32.totalorder %s33_s25, %s4629_s26  ;;  %p4635_p2 = scmp.lt.s32.totalorder %s4629_s26, %s4629_s26 }
   0x9   :  { %p4636_p3 = por %p4635_p2, %p4634_p1 }
   0xb   :  { %p4637_p4 = pnand %p4636_p3, %p4630_p0 }
   0xd   :  { %4640 = shalt.err (!%p4637_p4)
}
   0xe   :  { %s4792_s27 = smov 128   ;;  %s4793_s28 = smov 8  }
   0xf   :  { %38 = dma.hbm_to_vmem [thread:$0]  %s4958_s1, 49152, %s33_s25, [#allocation6], %s4792_s27, %s4792_s27, %s4793_s28  }
  0x10   :  { %s4794_s8 = smov [#allocation8]   ;;  %s4795_s10 = smov [#allocation11]  }
  0x11   :  { %s54_s9 = sshll.u32 %s4794_s8, 4  ;;  %s76_s11 = sshll.u32 %s4795_s10, 4  ;;  %s55_s9 = int_to_ptr.vmem [resolvable:$true] %s54_s9  ;;  %s77_s11 = int_to_ptr.vmem [resolvable:$true] %s76_s11 }
  0x12   :  { %s4649_s12 = scalar_lea.vmem %s55_s9, 4096  ;;  %p4654_p6 = scmp.lt.s32.totalorder %s55_s9, %s55_s9 }
  0x13   :  { %p4650_p5 = scmp.ne.s32.totalorder %s55_s9, %s4649_s12  ;;  %p4655_p7 = scmp.lt.s32.totalorder %s4649_s12, %s4649_s12 }
  0x15   :  { %p4656_p8 = por %p4655_p7, %p4654_p6 }
  0x17   :  { %p4657_p9 = pnand %p4656_p8, %p4650_p5 }
  0x19   :  { %4660 = shalt.err (!%p4657_p9)
}
  0x1a   :  { %60 = dma.hbm_to_vmem [thread:$0]  %s4960_s3, 4096, %s55_s9, [#allocation9], %s4792_s27, %s4792_s27, %s4793_s28  }
  0x1b   :  { %s4669_s15 = scalar_lea.vmem %s77_s11, 2048  ;;  %p4674_p11 = scmp.lt.s32.totalorder %s77_s11, %s77_s11 }
  0x1c   :  { %p4670_p10 = scmp.ne.s32.totalorder %s77_s11, %s4669_s15  ;;  %p4675_p12 = scmp.lt.s32.totalorder %s4669_s15, %s4669_s15 }
  0x1e   :  { %p4676_p13 = por %p4675_p12, %p4674_p11 }
  0x20   :  { %p4677_p0 = pnand %p4676_p13, %p4670_p10 }
  0x22   :  { %4680 = shalt.err (!%p4677_p0)
}
  0x23   :  { %s4796_s1 = smov 64   ;;  %s4797_s16 = smov 4  }
  0x24   :  { %82 = dma.hbm_to_vmem [thread:$0]  %s4962_s5, 2048, %s77_s11, [#allocation12], %s4796_s1, %s4796_s1, %s4797_s16  }
  0x25   :  { %s4798_s19 = smov [#allocation2]   ;;  %s4799_s21 = smov [#allocation7]  }
  0x26   :  { %s23_s20 = sshll.u32 %s4798_s19, 4  ;;  %s45_s22 = sshll.u32 %s4799_s21, 4  ;;  %s24_s20 = int_to_ptr.vmem [resolvable:$true] %s23_s20  ;;  %s46_s22 = int_to_ptr.vmem [resolvable:$true] %s45_s22 }
  0x27   :  { %s4689_s3 = scalar_lea.vmem %s24_s20, 1536  ;;  %p4694_p2 = scmp.lt.s32.totalorder %s24_s20, %s24_s20 }
  0x28   :  { %p4690_p1 = scmp.ne.s32.totalorder %s24_s20, %s4689_s3  ;;  %p4695_p3 = scmp.lt.s32.totalorder %s4689_s3, %s4689_s3 }
  0x2a   :  { %p4696_p4 = por %p4695_p3, %p4694_p2 }
  0x2c   :  { %p4697_p5 = pnand %p4696_p4, %p4690_p1 }
  0x2e   :  { %4700 = shalt.err (!%p4697_p5)
}
  0x2f   :  { %26 = dma.hbm_to_vmem [thread:$0]  %s4957_s0, 1536, %s24_s20, [#allocation3]  }
  0x30   :  { %s4709_s25 = scalar_lea.vmem %s46_s22, 32  ;;  %p4714_p7 = scmp.lt.s32.totalorder %s46_s22, %s46_s22 }
  0x31   :  { %p4710_p6 = scmp.ne.s32.totalorder %s46_s22, %s4709_s25  ;;  %p4715_p8 = scmp.lt.s32.totalorder %s4709_s25, %s4709_s25 }
  0x33   :  { %p4716_p9 = por %p4715_p8, %p4714_p7 }
  0x35   :  { %p4717_p10 = pnand %p4716_p9, %p4710_p6 }
  0x37   :  { %4720 = shalt.err (!%p4717_p10)
}
  0x38   :  { %48 = dma.hbm_to_vmem [thread:$0]  %s4959_s2, 32, %s46_s22, [#allocation6]  }
  0x39   :  { %s4800_s27 = smov [#allocation10]   ;;  %s4801_s29 = smov [#allocation13]  }
  0x3a   :  { %s67_s28 = sshll.u32 %s4800_s27, 4  ;;  %s89_s30 = sshll.u32 %s4801_s29, 4  ;;  %s68_s28 = int_to_ptr.vmem [resolvable:$true] %s67_s28  ;;  %s90_s30 = int_to_ptr.vmem [resolvable:$true] %s89_s30 }
  0x3b   :  { %s4729_s8 = scalar_lea.vmem %s68_s28, 32  ;;  %p4734_p12 = scmp.lt.s32.totalorder %s68_s28, %s68_s28 }
  0x3c   :  { %p4730_p11 = scmp.ne.s32.totalorder %s68_s28, %s4729_s8  ;;  %p4735_p13 = scmp.lt.s32.totalorder %s4729_s8, %s4729_s8 }
  0x3e   :  { %p4736_p0 = por %p4735_p13, %p4734_p12 }
  0x40   :  { %p4737_p1 = pnand %p4736_p0, %p4730_p11 }
  0x42   :  { %4740 = shalt.err (!%p4737_p1)
}
  0x43   :  { %70 = dma.hbm_to_vmem [thread:$0]  %s4961_s4, 32, %s68_s28, [#allocation9]  }
  0x44   :  { %s4749_s10 = scalar_lea.vmem %s90_s30, 16  ;;  %s4753_s2 = scalar_lea.vmem %s90_s30, 32 }
  0x45   :  { %p4750_p2 = scmp.ne.s32.totalorder %s90_s30, %s4749_s10  ;;  %p4754_p3 = scmp.lt.s32.totalorder %s90_s30, %s90_s30 }
  0x46   :  { %p4755_p4 = scmp.lt.s32.totalorder %s4753_s2, %s4749_s10 }
  0x48   :  { %p4756_p5 = por %p4755_p4, %p4754_p3 }
  0x4a   :  { %p4757_p6 = pnand %p4756_p5, %p4750_p2 }
  0x4c   :  { %4760 = shalt.err (!%p4757_p6)
}
  0x4d   :  { %92 = dma.hbm_to_vmem [thread:$0]  %s4963_s6, 16, %s90_s30, [#allocation12]  }
  0x4e   :  { %4781 = dma.done.wait [#allocation3], 1536  }
  0x4f   :  { %4782 = vsyncadd [#allocation3], 4294965760 }
  0x50   :  { %4783 = dma.done.wait [#allocation6], 49184  }
  0x51   :  { %4784 = vsyncadd [#allocation6], 4294918112 }
  0x52   :  { %4785 = dma.done.wait [#allocation9], 4128  }
  0x53   :  { %4786 = vsyncadd [#allocation9], 4294963168 }
  0x54   :  { %4787 = dma.done.wait [#allocation12], 2064  }
  0x55   :  { %4788 = vsyncadd [#allocation12], 4294965232  ;;  %v3957_v0 = vld [vmem:[#allocation5 + $0x74] ss:$8 sps:$4 sm:$0xff]   ;;  %v3961_v2 = vld [vmem:[#allocation5 + $0x70] ss:$8 sps:$4 sm:$0xff]  }
  0x56   :  { %v3959_v1 = vld [vmem:[#allocation5 + $0x174] ss:$8 sps:$4 sm:$0xff]   ;;  %2527 = vmatprep.subr.bf16.mxu0 %v3957_v0  ;;  %v3962_v3 = vld [vmem:[#allocation5 + $0x170] ss:$8 sps:$4 sm:$0xff]   ;;  %v3963_v4 = vld [vmem:[#allocation5 + $0x64] ss:$8 sps:$4 sm:$0xff]  }
  0x57   :  { %2568 = vmatprep.subr.bf16.mxu1 %v3959_v1  ;;  %2528 = vmatpush1.bf16.msra.mxu0 %v3961_v2  ;;  %v3965_v5 = vld [vmem:[#allocation5 + $0x164] ss:$8 sps:$4 sm:$0xff]   ;;  %v3967_v6 = vld [vmem:[#allocation5 + $0x60] ss:$8 sps:$4 sm:$0xff]   ;;  %v3969_v8 = vld [vmem:[#allocation5 + $0x54] ss:$8 sps:$4 sm:$0xff]  }
  0x58   :  { %2569 = vmatpush1.bf16.msra.mxu1 %v3962_v3  ;;  %2529 = vmatprep.subr.bf16.mxu0 %v3963_v4  ;;  %v3968_v7 = vld [vmem:[#allocation5 + $0x160] ss:$8 sps:$4 sm:$0xff]   ;;  %v3971_v9 = vld [vmem:[#allocation5 + $0x154] ss:$8 sps:$4 sm:$0xff]   ;;  %v3973_v10 = vld [vmem:[#allocation5 + $0x50] ss:$8 sps:$4 sm:$0xff]  }
  0x59   :  { %2570 = vmatprep.subr.bf16.mxu1 %v3965_v5  ;;  %v3974_v11 = vld [vmem:[#allocation5 + $0x150] ss:$8 sps:$4 sm:$0xff]   ;;  %v3975_v12 = vld [vmem:[#allocation5 + $0x44] ss:$8 sps:$4 sm:$0xff]   ;;  %v3979_v14 = vld [vmem:[#allocation5 + $0x40] ss:$8 sps:$4 sm:$0xff]  }
  0x5a   :  { %v3977_v13 = vld [vmem:[#allocation5 + $0x144] ss:$8 sps:$4 sm:$0xff]   ;;  %v3980_v15 = vld [vmem:[#allocation5 + $0x140] ss:$8 sps:$4 sm:$0xff]   ;;  %v3981_v16 = vld [vmem:[#allocation5 + $0x34] ss:$8 sps:$4 sm:$0xff]  }
  0x5b   :  { %2530 = vmatpush1.bf16.msra.mxu0 %v3967_v6  ;;  %v3983_v17 = vld [vmem:[#allocation5 + $0x134] ss:$8 sps:$4 sm:$0xff]   ;;  %v3985_v18 = vld [vmem:[#allocation5 + $0x30] ss:$8 sps:$4 sm:$0xff]   ;;  %v3987_v20 = vld [vmem:[#allocation5 + $0x24] ss:$8 sps:$4 sm:$0xff]  }
  0x5c   :  { %2571 = vmatpush1.bf16.msra.mxu1 %v3968_v7  ;;  %2531 = vmatprep.subr.bf16.mxu0 %v3969_v8  ;;  %v3986_v19 = vld [vmem:[#allocation5 + $0x130] ss:$8 sps:$4 sm:$0xff]   ;;  %v3989_v21 = vld [vmem:[#allocation5 + $0x124] ss:$8 sps:$4 sm:$0xff]   ;;  %v3991_v22 = vld [vmem:[#allocation5 + $0x20] ss:$8 sps:$4 sm:$0xff]  }
  0x5d   :  { %2572 = vmatprep.subr.bf16.mxu1 %v3971_v9  ;;  %v3992_v23 = vld [vmem:[#allocation5 + $0x120] ss:$8 sps:$4 sm:$0xff]   ;;  %v3993_v24 = vld [vmem:[#allocation5 + $0x14] ss:$8 sps:$4 sm:$0xff]   ;;  %v3997_v26 = vld [vmem:[#allocation5 + $0x10] ss:$8 sps:$4 sm:$0xff]  }
  0x5e   :  { %v3995_v25 = vld [vmem:[#allocation5 + $0x114] ss:$8 sps:$4 sm:$0xff]   ;;  %v3998_v27 = vld [vmem:[#allocation5 + $0x110] ss:$8 sps:$4 sm:$0xff]   ;;  %v3999_v28 = vld [vmem:[#allocation5 + $0x4] ss:$8 sps:$4 sm:$0xff]  }
  0x5f   :  { %2532 = vmatpush1.bf16.msra.mxu0 %v3973_v10  ;;  %v4001_v29 = vld [vmem:[#allocation5 + $0x104] ss:$8 sps:$4 sm:$0xff]   ;;  %v4003_v30 = vld [vmem:[#allocation5] ss:$8 sps:$4 sm:$0xff]   ;;  %v4005_v32 = vld [vmem:[#allocation5 + $0xf4] ss:$8 sps:$4 sm:$0xff]  }
  0x60   :  { %2573 = vmatpush1.bf16.msra.mxu1 %v3974_v11  ;;  %2533 = vmatprep.subr.bf16.mxu0 %v3975_v12  ;;  %v4004_v31 = vld [vmem:[#allocation5 + $0x100] ss:$8 sps:$4 sm:$0xff]   ;;  %v4007_v33 = vld [vmem:[#allocation5 + $0x1f4] ss:$8 sps:$4 sm:$0xff]   ;;  %v4009_v34 = vld [vmem:[#allocation5 + $0xf0] ss:$8 sps:$4 sm:$0xff]  }
  0x61   :  { %2574 = vmatprep.subr.bf16.mxu1 %v3977_v13  ;;  %v4010_v35 = vld [vmem:[#allocation5 + $0x1f0] ss:$8 sps:$4 sm:$0xff]   ;;  %v4011_v36 = vld [vmem:[#allocation5 + $0xe4] ss:$8 sps:$4 sm:$0xff]   ;;  %v4015_v38 = vld [vmem:[#allocation5 + $0xe0] ss:$8 sps:$4 sm:$0xff]  }
  0x62   :  { %v4013_v37 = vld [vmem:[#allocation5 + $0x1e4] ss:$8 sps:$4 sm:$0xff]   ;;  %v4016_v39 = vld [vmem:[#allocation5 + $0x1e0] ss:$8 sps:$4 sm:$0xff]   ;;  %v4017_v40 = vld [vmem:[#allocation5 + $0xd4] ss:$8 sps:$4 sm:$0xff]  }
  0x63   :  { %2534 = vmatpush1.bf16.msra.mxu0 %v3979_v14  ;;  %v4019_v41 = vld [vmem:[#allocation5 + $0x1d4] ss:$8 sps:$4 sm:$0xff]   ;;  %v4021_v42 = vld [vmem:[#allocation5 + $0xd0] ss:$8 sps:$4 sm:$0xff]   ;;  %v4023_v44 = vld [vmem:[#allocation5 + $0xc4] ss:$8 sps:$4 sm:$0xff]  }
  0x64   :  { %2575 = vmatpush1.bf16.msra.mxu1 %v3980_v15  ;;  %2535 = vmatprep.subr.bf16.mxu0 %v3981_v16  ;;  %v4022_v43 = vld [vmem:[#allocation5 + $0x1d0] ss:$8 sps:$4 sm:$0xff]   ;;  %v4025_v45 = vld [vmem:[#allocation5 + $0x1c4] ss:$8 sps:$4 sm:$0xff]   ;;  %v4027_v49 = vld [vmem:[#allocation5 + $0xc0] ss:$8 sps:$4 sm:$0xff]  }
  0x65   :  { %2576 = vmatprep.subr.bf16.mxu1 %v3983_v17  ;;  %v115_v46 = vld [vmem:[#allocation2] sm:$0xff]  ;;  %v116_v48 = vld [vmem:[#allocation2 + $0x8] sm:$0xff]  ;;  %v4029_v52 = vld [vmem:[#allocation5 + $0xb4] ss:$8 sps:$4 sm:$0xff]   ;;  %s4802_s4 = smov [#allocation14]  }
  0x66   :  { %v3467_v47 = vcombine.high %v115_v46, %v115_v46  ;;  %v4028_v50 = vld [vmem:[#allocation5 + $0x1c0] ss:$8 sps:$4 sm:$0xff]   ;;  %v3469_v51 = vcombine.high %v116_v48, %v116_v48  ;;  %v4031_v53 = vld [vmem:[#allocation5 + $0x1b4] ss:$8 sps:$4 sm:$0xff]   ;;  %v4033_v54 = vld [vmem:[#allocation5 + $0xb0] ss:$8 sps:$4 sm:$0xff]   ;;  %v3466_v6 = vcombine.low %v115_v46, %v115_v46  ;;  %v3468_v7 = vcombine.low %v116_v48, %v116_v48 }
  0x67   :  { %2536 = vmatpush1.bf16.msra.mxu0 %v3985_v18  ;;  %v4034_v55 = vld [vmem:[#allocation5 + $0x1b0] ss:$8 sps:$4 sm:$0xff]   ;;  %v4035_v56 = vld [vmem:[#allocation5 + $0xa4] ss:$8 sps:$4 sm:$0xff]   ;;  %v4039_v58 = vld [vmem:[#allocation5 + $0xa0] ss:$8 sps:$4 sm:$0xff]  }
  0x68   :  { %2577 = vmatpush1.bf16.msra.mxu1 %v3986_v19  ;;  %2537 = vmatprep.subr.bf16.mxu0 %v3987_v20  ;;  %v4037_v57 = vld [vmem:[#allocation5 + $0x1a4] ss:$8 sps:$4 sm:$0xff]   ;;  %v4040_v59 = vld [vmem:[#allocation5 + $0x1a0] ss:$8 sps:$4 sm:$0xff]   ;;  %v4041_v60 = vld [vmem:[#allocation5 + $0x94] ss:$8 sps:$4 sm:$0xff]  }
  0x69   :  { %2578 = vmatprep.subr.bf16.mxu1 %v3989_v21  ;;  %2559 = vmatprep.mubr.bf16.mxu0 %v3467_v47  ;;  %v4043_v61 = vld [vmem:[#allocation5 + $0x194] ss:$8 sps:$4 sm:$0xff]   ;;  %v4045_v62 = vld [vmem:[#allocation5 + $0x90] ss:$8 sps:$4 sm:$0xff]   ;;  %v4047_v0 = vld [vmem:[#allocation5 + $0x84] ss:$8 sps:$4 sm:$0xff]  }
  0x6a   :  { %2600 = vmatprep.mubr.bf16.mxu1 %v3469_v51  ;;  %v4046_v63 = vld [vmem:[#allocation5 + $0x190] ss:$8 sps:$4 sm:$0xff]   ;;  %v4049_v1 = vld [vmem:[#allocation5 + $0x184] ss:$8 sps:$4 sm:$0xff]   ;;  %v4051_v2 = vld [vmem:[#allocation5 + $0x80] ss:$8 sps:$4 sm:$0xff]  }
  0x6b   :  { %2538 = vmatpush1.bf16.msra.mxu0 %v3991_v22  ;;  %v4052_v3 = vld [vmem:[#allocation5 + $0x180] ss:$8 sps:$4 sm:$0xff]   ;;  %v4059_v4 = vld [vmem:[#allocation5 + $0x274] ss:$8 sps:$4 sm:$0xff]   ;;  %v4057_v8 = vld [vmem:[#allocation5 + $0x270] ss:$8 sps:$4 sm:$0xff]  }
  0x6c   :  { %2579 = vmatpush1.bf16.msra.mxu1 %v3992_v23  ;;  %2539 = vmatprep.subr.bf16.mxu0 %v3993_v24  ;;  %v4062_v5 = vld [vmem:[#allocation5 + $0x374] ss:$8 sps:$4 sm:$0xff]   ;;  %v4060_v9 = vld [vmem:[#allocation5 + $0x370] ss:$8 sps:$4 sm:$0xff]   ;;  %v4065_v10 = vld [vmem:[#allocation5 + $0x264] ss:$8 sps:$4 sm:$0xff]  }
  0x6d   :  { %2580 = vmatprep.subr.bf16.mxu1 %v3995_v25  ;;  %v4068_v11 = vld [vmem:[#allocation5 + $0x364] ss:$8 sps:$4 sm:$0xff]   ;;  %v4063_v12 = vld [vmem:[#allocation5 + $0x260] ss:$8 sps:$4 sm:$0xff]   ;;  %v4071_v14 = vld [vmem:[#allocation5 + $0x254] ss:$8 sps:$4 sm:$0xff]  }
  0x6e   :  { %v4066_v13 = vld [vmem:[#allocation5 + $0x360] ss:$8 sps:$4 sm:$0xff]   ;;  %v4074_v15 = vld [vmem:[#allocation5 + $0x354] ss:$8 sps:$4 sm:$0xff]   ;;  %v4069_v16 = vld [vmem:[#allocation5 + $0x250] ss:$8 sps:$4 sm:$0xff]  }
  0x6f   :  { %2540 = vmatpush1.bf16.msra.mxu0 %v3997_v26  ;;  %v4072_v17 = vld [vmem:[#allocation5 + $0x350] ss:$8 sps:$4 sm:$0xff]   ;;  %v4077_v18 = vld [vmem:[#allocation5 + $0x244] ss:$8 sps:$4 sm:$0xff]   ;;  %v4075_v20 = vld [vmem:[#allocation5 + $0x240] ss:$8 sps:$4 sm:$0xff]  }
  0x70   :  { %2581 = vmatpush1.bf16.msra.mxu1 %v3998_v27  ;;  %2541 = vmatprep.subr.bf16.mxu0 %v3999_v28  ;;  %v4080_v19 = vld [vmem:[#allocation5 + $0x344] ss:$8 sps:$4 sm:$0xff]   ;;  %v4078_v21 = vld [vmem:[#allocation5 + $0x340] ss:$8 sps:$4 sm:$0xff]   ;;  %v4083_v22 = vld [vmem:[#allocation5 + $0x234] ss:$8 sps:$4 sm:$0xff]  }
  0x71   :  { %2582 = vmatprep.subr.bf16.mxu1 %v4001_v29  ;;  %v4086_v23 = vld [vmem:[#allocation5 + $0x334] ss:$8 sps:$4 sm:$0xff]   ;;  %v4081_v24 = vld [vmem:[#allocation5 + $0x230] ss:$8 sps:$4 sm:$0xff]   ;;  %v4089_v26 = vld [vmem:[#allocation5 + $0x224] ss:$8 sps:$4 sm:$0xff]  }
  0x72   :  { %v4084_v25 = vld [vmem:[#allocation5 + $0x330] ss:$8 sps:$4 sm:$0xff]   ;;  %v4092_v27 = vld [vmem:[#allocation5 + $0x324] ss:$8 sps:$4 sm:$0xff]   ;;  %v4087_v28 = vld [vmem:[#allocation5 + $0x220] ss:$8 sps:$4 sm:$0xff]  }
  0x73   :  { %2542 = vmatpush1.bf16.msra.mxu0 %v4003_v30  ;;  %v4090_v29 = vld [vmem:[#allocation5 + $0x320] ss:$8 sps:$4 sm:$0xff]   ;;  %v4095_v30 = vld [vmem:[#allocation5 + $0x214] ss:$8 sps:$4 sm:$0xff]   ;;  %v4113_v46 = vld [vmem:[#allocation5 + $0x2e4] ss:$8 sps:$4 sm:$0xff]  }
  0x74   :  { %2583 = vmatpush1.bf16.msra.mxu1 %v4004_v31  ;;  %2543 = vmatprep.subr.bf16.mxu0 %v4005_v32  ;;  %v4098_v31 = vld [vmem:[#allocation5 + $0x314] ss:$8 sps:$4 sm:$0xff]   ;;  %v4116_v47 = vld [vmem:[#allocation5 + $0x3e4] ss:$8 sps:$4 sm:$0xff]   ;;  %v4111_v48 = vld [vmem:[#allocation5 + $0x2e0] ss:$8 sps:$4 sm:$0xff]  }
  0x75   :  { %2584 = vmatprep.subr.bf16.mxu1 %v4007_v33  ;;  %v4864_v32 = vld [vmem:[#allocation2 + $0x10] sm:$0xff]  ;;  %v4866_v33 = vld [vmem:[#allocation2 + $0x18] sm:$0xff]  ;;  %s3454_s6 = sshll.u32 %s4802_s4, 4  ;;  %s3455_s6 = int_to_ptr.vmem [resolvable:$true] %s3454_s6 }
  0x76   :  { %v4122_v51 = vld [vmem:[#allocation5 + $0x3d4] ss:$8 sps:$4 sm:$0xff]   ;;  %s4761_s13 = scalar_lea.vmem %s3455_s6, 128  ;;  %p4766_p8 = scmp.lt.s32.totalorder %s3455_s6, %s3455_s6 }
  0x77   :  { %2544 = vmatpush2.bf16.msra.mxu0 %v4009_v34  ;;  %v4093_v34 = vld [vmem:[#allocation5 + $0x210] ss:$8 sps:$4 sm:$0xff]   ;;  %p4762_p7 = scmp.ne.s32.totalorder %s3455_s6, %s4761_s13  ;;  %p4767_p9 = scmp.lt.s32.totalorder %s4761_s13, %s4761_s13 }
  0x78   :  { %2585 = vmatpush2.bf16.msra.mxu1 %v4010_v35  ;;  %2545 = vmatprep.subr.bf16.mxu0 %v4011_v36  ;;  %v4096_v35 = vld [vmem:[#allocation5 + $0x310] ss:$8 sps:$4 sm:$0xff]   ;;  %v3471_v36 = vcombine.high %v4864_v32, %v4864_v32 }
  0x79   :  { %2586 = vmatprep.subr.bf16.mxu1 %v4013_v37  ;;  %v3473_v37 = vcombine.high %v4866_v33, %v4866_v33  ;;  %p4768_p10 = por %p4767_p9, %p4766_p8 }
  0x7b   :  { %2546 = vmatpush2.bf16.msra.mxu0 %v4015_v38  ;;  %v4101_v38 = vld [vmem:[#allocation5 + $0x204] ss:$8 sps:$4 sm:$0xff]   ;;  %p4769_p11 = pnand %p4768_p10, %p4762_p7 }
  0x7c   :  { %2587 = vmatpush2.bf16.msra.mxu1 %v4016_v39  ;;  %2547 = vmatprep.subr.bf16.mxu0 %v4017_v40  ;;  %v4104_v39 = vld [vmem:[#allocation5 + $0x304] ss:$8 sps:$4 sm:$0xff]   ;;  %v4099_v40 = vld [vmem:[#allocation5 + $0x200] ss:$8 sps:$4 sm:$0xff]  }
  0x7d   :  { %2588 = vmatprep.subr.bf16.mxu1 %v4019_v41  ;;  %v4102_v41 = vld [vmem:[#allocation5 + $0x300] ss:$8 sps:$4 sm:$0xff]  }
  0x7f   :  { %2548 = vmatpush2.bf16.msra.mxu0 %v4021_v42  ;;  %v4107_v42 = vld [vmem:[#allocation5 + $0x2f4] ss:$8 sps:$4 sm:$0xff]  }
  0x80   :  { %2589 = vmatpush2.bf16.msra.mxu1 %v4022_v43  ;;  %2549 = vmatprep.subr.bf16.mxu0 %v4023_v44  ;;  %v4110_v43 = vld [vmem:[#allocation5 + $0x3f4] ss:$8 sps:$4 sm:$0xff]   ;;  %v4105_v44 = vld [vmem:[#allocation5 + $0x2f0] ss:$8 sps:$4 sm:$0xff]  }
  0x81   :  { %2590 = vmatprep.subr.bf16.mxu1 %v4025_v45  ;;  %v4108_v45 = vld [vmem:[#allocation5 + $0x3f0] ss:$8 sps:$4 sm:$0xff]  }
  0x83   :  { %2550 = vmatpush2.bf16.msra.mxu0 %v4027_v49  ;;  %v4114_v49 = vld [vmem:[#allocation5 + $0x3e0] ss:$8 sps:$4 sm:$0xff]  }
  0x84   :  { %2591 = vmatpush2.bf16.msra.mxu1 %v4028_v50  ;;  %2551 = vmatprep.subr.bf16.mxu0 %v4029_v52  ;;  %v4119_v50 = vld [vmem:[#allocation5 + $0x2d4] ss:$8 sps:$4 sm:$0xff]   ;;  %v4117_v52 = vld [vmem:[#allocation5 + $0x2d0] ss:$8 sps:$4 sm:$0xff]  }
  0x85   :  { %2592 = vmatprep.subr.bf16.mxu1 %v4031_v53  ;;  %v4120_v53 = vld [vmem:[#allocation5 + $0x3d0] ss:$8 sps:$4 sm:$0xff]  }
  0x87   :  { %2552 = vmatpush2.bf16.msra.mxu0 %v4033_v54  ;;  %v4125_v54 = vld [vmem:[#allocation5 + $0x2c4] ss:$8 sps:$4 sm:$0xff]  }
  0x88   :  { %2593 = vmatpush2.bf16.msra.mxu1 %v4034_v55  ;;  %2553 = vmatprep.subr.bf16.mxu0 %v4035_v56  ;;  %v4128_v55 = vld [vmem:[#allocation5 + $0x3c4] ss:$8 sps:$4 sm:$0xff]   ;;  %v4123_v56 = vld [vmem:[#allocation5 + $0x2c0] ss:$8 sps:$4 sm:$0xff]  }
  0x89   :  { %2594 = vmatprep.subr.bf16.mxu1 %v4037_v57  ;;  %v4126_v57 = vld [vmem:[#allocation5 + $0x3c0] ss:$8 sps:$4 sm:$0xff]  }
  0x8b   :  { %2554 = vmatpush2.bf16.msra.mxu0 %v4039_v58  ;;  %v4131_v58 = vld [vmem:[#allocation5 + $0x2b4] ss:$8 sps:$4 sm:$0xff]  }
  0x8c   :  { %2595 = vmatpush2.bf16.msra.mxu1 %v4040_v59  ;;  %2555 = vmatprep.subr.bf16.mxu0 %v4041_v60  ;;  %v4134_v59 = vld [vmem:[#allocation5 + $0x3b4] ss:$8 sps:$4 sm:$0xff]   ;;  %v4129_v60 = vld [vmem:[#allocation5 + $0x2b0] ss:$8 sps:$4 sm:$0xff]  }
  0x8d   :  { %2596 = vmatprep.subr.bf16.mxu1 %v4043_v61  ;;  %v4132_v61 = vld [vmem:[#allocation5 + $0x3b0] ss:$8 sps:$4 sm:$0xff]  }
  0x8f   :  { %2556 = vmatpush2.bf16.msra.mxu0 %v4045_v62  ;;  %v4137_v62 = vld [vmem:[#allocation5 + $0x2a4] ss:$8 sps:$4 sm:$0xff]  }
  0x90   :  { %2597 = vmatpush2.bf16.msra.mxu1 %v4046_v63  ;;  %2557 = vmatprep.subr.bf16.mxu0 %v4047_v0  ;;  %v4140_v63 = vld [vmem:[#allocation5 + $0x3a4] ss:$8 sps:$4 sm:$0xff]   ;;  %v4135_v0 = vld [vmem:[#allocation5 + $0x2a0] ss:$8 sps:$4 sm:$0xff]  }
  0x91   :  { %2598 = vmatprep.subr.bf16.mxu1 %v4049_v1  ;;  %v4138_v1 = vld [vmem:[#allocation5 + $0x3a0] ss:$8 sps:$4 sm:$0xff]  }
  0x93   :  { %2558 = vmatpush2.bf16.msra.mxu0 %v4051_v2  ;;  %v4143_v2 = vld [vmem:[#allocation5 + $0x294] ss:$8 sps:$4 sm:$0xff]  }
  0x94   :  { %2599 = vmatpush2.bf16.msra.mxu1 %v4052_v3  ;;  %2609 = vmatprep.subr.bf16.mxu0 %v4059_v4  ;;  %v4146_v3 = vld [vmem:[#allocation5 + $0x394] ss:$8 sps:$4 sm:$0xff]   ;;  %v4141_v4 = vld [vmem:[#allocation5 + $0x290] ss:$8 sps:$4 sm:$0xff]  }
  0x95   :  { %2650 = vmatprep.subr.bf16.mxu1 %v4062_v5  ;;  %v4144_v5 = vld [vmem:[#allocation5 + $0x390] ss:$8 sps:$4 sm:$0xff]  }
  0x96   :  { %2560 = vmatmul.mubr.bf16.vlgmr.msra.gmra.mxu0 %v3466_v6  ;;  %v4149_v6 = vld [vmem:[#allocation5 + $0x284] ss:$8 sps:$4 sm:$0xff]  }
  0x97   :  { %2601 = vmatmul.mubr.bf16.vlgmr.msra.gmra.mxu1 %v3468_v7  ;;  %2610 = vmatpush1.bf16.msra.mxu0 %v4057_v8  ;;  %v4152_v7 = vld [vmem:[#allocation5 + $0x384] ss:$8 sps:$4 sm:$0xff]   ;;  %v4147_v8 = vld [vmem:[#allocation5 + $0x280] ss:$8 sps:$4 sm:$0xff]  }
  0x98   :  { %2651 = vmatpush1.bf16.msra.mxu1 %v4060_v9  ;;  %2611 = vmatprep.subr.bf16.mxu0 %v4065_v10  ;;  %v4150_v9 = vld [vmem:[#allocation5 + $0x380] ss:$8 sps:$4 sm:$0xff]   ;;  %v4159_v10 = vld [vmem:[#allocation5 + $0x474] ss:$8 sps:$4 sm:$0xff]  }
  0x99   :  { %2652 = vmatprep.subr.bf16.mxu1 %v4068_v11  ;;  %2641 = vmatprep.mubr.bf16.mxu0 %v3471_v36  ;;  %v4162_v11 = vld [vmem:[#allocation5 + $0x574] ss:$8 sps:$4 sm:$0xff]   ;;  %v4189_v36 = vld [vmem:[#allocation5 + $0x424] ss:$8 sps:$4 sm:$0xff]  }
  0x9a   :  { %2682 = vmatprep.mubr.bf16.mxu1 %v3473_v37  ;;  %v4192_v37 = vld [vmem:[#allocation5 + $0x524] ss:$8 sps:$4 sm:$0xff]  }
  0x9b   :  { %2612 = vmatpush1.bf16.msra.mxu0 %v4063_v12  ;;  %v3470_v12 = vcombine.low %v4864_v32, %v4864_v32  ;;  %v4183_v32 = vld [vmem:[#allocation5 + $0x434] ss:$8 sps:$4 sm:$0xff]  }
  0x9c   :  { %2653 = vmatpush1.bf16.msra.mxu1 %v4066_v13  ;;  %2613 = vmatprep.subr.bf16.mxu0 %v4071_v14  ;;  %v3472_v13 = vcombine.low %v4866_v33, %v4866_v33  ;;  %v4157_v14 = vld [vmem:[#allocation5 + $0x470] ss:$8 sps:$4 sm:$0xff]   ;;  %v4186_v33 = vld [vmem:[#allocation5 + $0x534] ss:$8 sps:$4 sm:$0xff]  }
  0x9d   :  { %2654 = vmatprep.subr.bf16.mxu1 %v4074_v15  ;;  %v4160_v15 = vld [vmem:[#allocation5 + $0x570] ss:$8 sps:$4 sm:$0xff]  }
  0x9f   :  { %2614 = vmatpush1.bf16.msra.mxu0 %v4069_v16  ;;  %v4165_v16 = vld [vmem:[#allocation5 + $0x464] ss:$8 sps:$4 sm:$0xff]  }
  0xa0   :  { %2655 = vmatpush1.bf16.msra.mxu1 %v4072_v17  ;;  %2615 = vmatprep.subr.bf16.mxu0 %v4077_v18  ;;  %v4168_v17 = vld [vmem:[#allocation5 + $0x564] ss:$8 sps:$4 sm:$0xff]  }
  0xa1   :  { %2656 = vmatprep.subr.bf16.mxu1 %v4080_v19  ;;  %v4876_v18 = vld [vmem:[#allocation2 + $0x20] sm:$0xff]  ;;  %v4878_v19 = vld [vmem:[#allocation2 + $0x28] sm:$0xff] }
  0xa3   :  { %2616 = vmatpush1.bf16.msra.mxu0 %v4075_v20  ;;  %v3475_v20 = vcombine.high %v4876_v18, %v4876_v18 }
  0xa4   :  { %2657 = vmatpush1.bf16.msra.mxu1 %v4078_v21  ;;  %2617 = vmatprep.subr.bf16.mxu0 %v4083_v22  ;;  %v3477_v21 = vcombine.high %v4878_v19, %v4878_v19  ;;  %v4163_v22 = vld [vmem:[#allocation5 + $0x460] ss:$8 sps:$4 sm:$0xff]  }
  0xa5   :  { %2658 = vmatprep.subr.bf16.mxu1 %v4086_v23  ;;  %v4166_v23 = vld [vmem:[#allocation5 + $0x560] ss:$8 sps:$4 sm:$0xff]  }
  0xa7   :  { %2618 = vmatpush1.bf16.msra.mxu0 %v4081_v24  ;;  %v4171_v24 = vld [vmem:[#allocation5 + $0x454] ss:$8 sps:$4 sm:$0xff]  }
  0xa8   :  { %2659 = vmatpush1.bf16.msra.mxu1 %v4084_v25  ;;  %2619 = vmatprep.subr.bf16.mxu0 %v4089_v26  ;;  %v4174_v25 = vld [vmem:[#allocation5 + $0x554] ss:$8 sps:$4 sm:$0xff]   ;;  %v4169_v26 = vld [vmem:[#allocation5 + $0x450] ss:$8 sps:$4 sm:$0xff]  }
  0xa9   :  { %2660 = vmatprep.subr.bf16.mxu1 %v4092_v27  ;;  %v4172_v27 = vld [vmem:[#allocation5 + $0x550] ss:$8 sps:$4 sm:$0xff]  }
  0xab   :  { %2620 = vmatpush1.bf16.msra.mxu0 %v4087_v28  ;;  %v4177_v28 = vld [vmem:[#allocation5 + $0x444] ss:$8 sps:$4 sm:$0xff]  }
  0xac   :  { %2661 = vmatpush1.bf16.msra.mxu1 %v4090_v29  ;;  %2621 = vmatprep.subr.bf16.mxu0 %v4095_v30  ;;  %v4180_v29 = vld [vmem:[#allocation5 + $0x544] ss:$8 sps:$4 sm:$0xff]   ;;  %v4175_v30 = vld [vmem:[#allocation5 + $0x440] ss:$8 sps:$4 sm:$0xff]  }
  0xad   :  { %2662 = vmatprep.subr.bf16.mxu1 %v4098_v31  ;;  %v4178_v31 = vld [vmem:[#allocation5 + $0x540] ss:$8 sps:$4 sm:$0xff]  }
  0xaf   :  { %2622 = vmatpush1.bf16.msra.mxu0 %v4093_v34  ;;  %v4181_v34 = vld [vmem:[#allocation5 + $0x430] ss:$8 sps:$4 sm:$0xff]  }
  0xb0   :  { %2663 = vmatpush1.bf16.msra.mxu1 %v4096_v35  ;;  %2623 = vmatprep.subr.bf16.mxu0 %v4101_v38  ;;  %v4184_v35 = vld [vmem:[#allocation5 + $0x530] ss:$8 sps:$4 sm:$0xff]   ;;  %v4187_v38 = vld [vmem:[#allocation5 + $0x420] ss:$8 sps:$4 sm:$0xff]  }
  0xb1   :  { %2664 = vmatprep.subr.bf16.mxu1 %v4104_v39  ;;  %v4190_v39 = vld [vmem:[#allocation5 + $0x520] ss:$8 sps:$4 sm:$0xff]  }
  0xb3   :  { %2624 = vmatpush1.bf16.msra.mxu0 %v4099_v40  ;;  %v4195_v40 = vld [vmem:[#allocation5 + $0x414] ss:$8 sps:$4 sm:$0xff]  }
  0xb4   :  { %2665 = vmatpush1.bf16.msra.mxu1 %v4102_v41  ;;  %2625 = vmatprep.subr.bf16.mxu0 %v4107_v42  ;;  %v4198_v41 = vld [vmem:[#allocation5 + $0x514] ss:$8 sps:$4 sm:$0xff]   ;;  %v4193_v42 = vld [vmem:[#allocation5 + $0x410] ss:$8 sps:$4 sm:$0xff]  }
  0xb5   :  { %2666 = vmatprep.subr.bf16.mxu1 %v4110_v43  ;;  %v4196_v43 = vld [vmem:[#allocation5 + $0x510] ss:$8 sps:$4 sm:$0xff]  }
  0xb7   :  { %2626 = vmatpush2.bf16.msra.mxu0 %v4105_v44  ;;  %v4201_v44 = vld [vmem:[#allocation5 + $0x404] ss:$8 sps:$4 sm:$0xff]  }
  0xb8   :  { %2667 = vmatpush2.bf16.msra.mxu1 %v4108_v45  ;;  %2627 = vmatprep.subr.bf16.mxu0 %v4113_v46  ;;  %v4204_v45 = vld [vmem:[#allocation5 + $0x504] ss:$8 sps:$4 sm:$0xff]   ;;  %v4199_v46 = vld [vmem:[#allocation5 + $0x400] ss:$8 sps:$4 sm:$0xff]  }
  0xb9   :  { %2668 = vmatprep.subr.bf16.mxu1 %v4116_v47  ;;  %v4202_v47 = vld [vmem:[#allocation5 + $0x500] ss:$8 sps:$4 sm:$0xff]  }
  0xbb   :  { %2628 = vmatpush2.bf16.msra.mxu0 %v4111_v48  ;;  %v4207_v48 = vld [vmem:[#allocation5 + $0x4f4] ss:$8 sps:$4 sm:$0xff]  }
  0xbc   :  { %2669 = vmatpush2.bf16.msra.mxu1 %v4114_v49  ;;  %2629 = vmatprep.subr.bf16.mxu0 %v4119_v50  ;;  %v4210_v49 = vld [vmem:[#allocation5 + $0x5f4] ss:$8 sps:$4 sm:$0xff]   ;;  %v4205_v50 = vld [vmem:[#allocation5 + $0x4f0] ss:$8 sps:$4 sm:$0xff]  }
  0xbd   :  { %2670 = vmatprep.subr.bf16.mxu1 %v4122_v51  ;;  %v4208_v51 = vld [vmem:[#allocation5 + $0x5f0] ss:$8 sps:$4 sm:$0xff]  }
  0xbf   :  { %2630 = vmatpush2.bf16.msra.mxu0 %v4117_v52  ;;  %v4213_v52 = vld [vmem:[#allocation5 + $0x4e4] ss:$8 sps:$4 sm:$0xff]  }
  0xc0   :  { %2671 = vmatpush2.bf16.msra.mxu1 %v4120_v53  ;;  %2631 = vmatprep.subr.bf16.mxu0 %v4125_v54  ;;  %v4216_v53 = vld [vmem:[#allocation5 + $0x5e4] ss:$8 sps:$4 sm:$0xff]   ;;  %v4211_v54 = vld [vmem:[#allocation5 + $0x4e0] ss:$8 sps:$4 sm:$0xff]  }
  0xc1   :  { %2672 = vmatprep.subr.bf16.mxu1 %v4128_v55  ;;  %v4214_v55 = vld [vmem:[#allocation5 + $0x5e0] ss:$8 sps:$4 sm:$0xff]  }
  0xc3   :  { %2632 = vmatpush2.bf16.msra.mxu0 %v4123_v56  ;;  %v4219_v56 = vld [vmem:[#allocation5 + $0x4d4] ss:$8 sps:$4 sm:$0xff]  }
  0xc4   :  { %2673 = vmatpush2.bf16.msra.mxu1 %v4126_v57  ;;  %2633 = vmatprep.subr.bf16.mxu0 %v4131_v58  ;;  %v4222_v57 = vld [vmem:[#allocation5 + $0x5d4] ss:$8 sps:$4 sm:$0xff]   ;;  %v4217_v58 = vld [vmem:[#allocation5 + $0x4d0] ss:$8 sps:$4 sm:$0xff]  }
  0xc5   :  { %2674 = vmatprep.subr.bf16.mxu1 %v4134_v59  ;;  %v4220_v59 = vld [vmem:[#allocation5 + $0x5d0] ss:$8 sps:$4 sm:$0xff]  }
  0xc7   :  { %2634 = vmatpush2.bf16.msra.mxu0 %v4129_v60  ;;  %v4225_v60 = vld [vmem:[#allocation5 + $0x4c4] ss:$8 sps:$4 sm:$0xff]  }
  0xc8   :  { %2675 = vmatpush2.bf16.msra.mxu1 %v4132_v61  ;;  %2635 = vmatprep.subr.bf16.mxu0 %v4137_v62  ;;  %v4228_v61 = vld [vmem:[#allocation5 + $0x5c4] ss:$8 sps:$4 sm:$0xff]   ;;  %v4223_v62 = vld [vmem:[#allocation5 + $0x4c0] ss:$8 sps:$4 sm:$0xff]  }
  0xc9   :  { %2676 = vmatprep.subr.bf16.mxu1 %v4140_v63  ;;  %v4226_v63 = vld [vmem:[#allocation5 + $0x5c0] ss:$8 sps:$4 sm:$0xff]  }
  0xcb   :  { %2636 = vmatpush2.bf16.msra.mxu0 %v4135_v0  ;;  %v4231_v0 = vld [vmem:[#allocation5 + $0x4b4] ss:$8 sps:$4 sm:$0xff]  }
  0xcc   :  { %2677 = vmatpush2.bf16.msra.mxu1 %v4138_v1  ;;  %2637 = vmatprep.subr.bf16.mxu0 %v4143_v2  ;;  %v4234_v1 = vld [vmem:[#allocation5 + $0x5b4] ss:$8 sps:$4 sm:$0xff]   ;;  %v4229_v2 = vld [vmem:[#allocation5 + $0x4b0] ss:$8 sps:$4 sm:$0xff]  }
  0xcd   :  { %2678 = vmatprep.subr.bf16.mxu1 %v4146_v3  ;;  %v4232_v3 = vld [vmem:[#allocation5 + $0x5b0] ss:$8 sps:$4 sm:$0xff]  }
  0xcf   :  { %2638 = vmatpush2.bf16.msra.mxu0 %v4141_v4  ;;  %v4237_v4 = vld [vmem:[#allocation5 + $0x4a4] ss:$8 sps:$4 sm:$0xff]  }
  0xd0   :  { %2679 = vmatpush2.bf16.msra.mxu1 %v4144_v5  ;;  %2639 = vmatprep.subr.bf16.mxu0 %v4149_v6  ;;  %v4240_v5 = vld [vmem:[#allocation5 + $0x5a4] ss:$8 sps:$4 sm:$0xff]   ;;  %v4235_v6 = vld [vmem:[#allocation5 + $0x4a0] ss:$8 sps:$4 sm:$0xff]  }
  0xd1   :  { %2680 = vmatprep.subr.bf16.mxu1 %v4152_v7  ;;  %v4238_v7 = vld [vmem:[#allocation5 + $0x5a0] ss:$8 sps:$4 sm:$0xff]  }
  0xd3   :  { %2640 = vmatpush2.bf16.msra.mxu0 %v4147_v8  ;;  %v4243_v8 = vld [vmem:[#allocation5 + $0x494] ss:$8 sps:$4 sm:$0xff]  }
  0xd4   :  { %2681 = vmatpush2.bf16.msra.mxu1 %v4150_v9  ;;  %2691 = vmatprep.subr.bf16.mxu0 %v4159_v10  ;;  %v4246_v9 = vld [vmem:[#allocation5 + $0x594] ss:$8 sps:$4 sm:$0xff]   ;;  %v4241_v10 = vld [vmem:[#allocation5 + $0x490] ss:$8 sps:$4 sm:$0xff]  }
  0xd5   :  { %2732 = vmatprep.subr.bf16.mxu1 %v4162_v11  ;;  %v4244_v11 = vld [vmem:[#allocation5 + $0x590] ss:$8 sps:$4 sm:$0xff]  }
  0xd6   :  { %2642 = vmatmul.mubr.bf16.vlgmr.msra.gmra.mxu0 %v3470_v12  ;;  %v4249_v12 = vld [vmem:[#allocation5 + $0x484] ss:$8 sps:$4 sm:$0xff]  }
  0xd7   :  { %2683 = vmatmul.mubr.bf16.vlgmr.msra.gmra.mxu1 %v3472_v13  ;;  %2692 = vmatpush1.bf16.msra.mxu0 %v4157_v14  ;;  %v4252_v13 = vld [vmem:[#allocation5 + $0x584] ss:$8 sps:$4 sm:$0xff]   ;;  %v4247_v14 = vld [vmem:[#allocation5 + $0x480] ss:$8 sps:$4 sm:$0xff]  }
  0xd8   :  { %2733 = vmatpush1.bf16.msra.mxu1 %v4160_v15  ;;  %2693 = vmatprep.subr.bf16.mxu0 %v4165_v16  ;;  %v4250_v15 = vld [vmem:[#allocation5 + $0x580] ss:$8 sps:$4 sm:$0xff]   ;;  %v4259_v16 = vld [vmem:[#allocation5 + $0x674] ss:$8 sps:$4 sm:$0xff]  }
  0xd9   :  { %2734 = vmatprep.subr.bf16.mxu1 %v4168_v17  ;;  %2723 = vmatprep.mubr.bf16.mxu0 %v3475_v20  ;;  %v4262_v17 = vld [vmem:[#allocation5 + $0x774] ss:$8 sps:$4 sm:$0xff]   ;;  %v4257_v20 = vld [vmem:[#allocation5 + $0x670] ss:$8 sps:$4 sm:$0xff]  }
  0xda   :  { %2764 = vmatprep.mubr.bf16.mxu1 %v3477_v21  ;;  %v4884_v21 = vld [vmem:[#allocation2 + $0x30] sm:$0xff] }
  0xdb   :  { %2694 = vmatpush1.bf16.msra.mxu0 %v4163_v22  ;;  %v3474_v22 = vcombine.low %v4876_v18, %v4876_v18  ;;  %v4263_v18 = vld [vmem:[#allocation5 + $0x660] ss:$8 sps:$4 sm:$0xff]  }
  0xdc   :  { %2735 = vmatpush1.bf16.msra.mxu1 %v4166_v23  ;;  %2695 = vmatprep.subr.bf16.mxu0 %v4171_v24  ;;  %v3476_v23 = vcombine.low %v4878_v19, %v4878_v19  ;;  %v4890_v24 = vld [vmem:[#allocation2 + $0x38] sm:$0xff]  ;;  %v4266_v19 = vld [vmem:[#allocation5 + $0x760] ss:$8 sps:$4 sm:$0xff]  }
  0xdd   :  { %2736 = vmatprep.subr.bf16.mxu1 %v4174_v25  ;;  %v4260_v25 = vld [vmem:[#allocation5 + $0x770] ss:$8 sps:$4 sm:$0xff]  }
  0xdf   :  { %2696 = vmatpush1.bf16.msra.mxu0 %v4169_v26  ;;  %v4265_v26 = vld [vmem:[#allocation5 + $0x664] ss:$8 sps:$4 sm:$0xff]  }
  0xe0   :  { %2737 = vmatpush1.bf16.msra.mxu1 %v4172_v27  ;;  %2697 = vmatprep.subr.bf16.mxu0 %v4177_v28  ;;  %v4268_v27 = vld [vmem:[#allocation5 + $0x764] ss:$8 sps:$4 sm:$0xff]   ;;  %v3479_v28 = vcombine.high %v4884_v21, %v4884_v21 }
  0xe1   :  { %2738 = vmatprep.subr.bf16.mxu1 %v4180_v29  ;;  %v3481_v29 = vcombine.high %v4890_v24, %v4890_v24 }
  0xe3   :  { %2698 = vmatpush1.bf16.msra.mxu0 %v4175_v30  ;;  %v4271_v30 = vld [vmem:[#allocation5 + $0x654] ss:$8 sps:$4 sm:$0xff]  }
  0xe4   :  { %2739 = vmatpush1.bf16.msra.mxu1 %v4178_v31  ;;  %2699 = vmatprep.subr.bf16.mxu0 %v4183_v32  ;;  %v4274_v31 = vld [vmem:[#allocation5 + $0x754] ss:$8 sps:$4 sm:$0xff]   ;;  %v4269_v32 = vld [vmem:[#allocation5 + $0x650] ss:$8 sps:$4 sm:$0xff]  }
  0xe5   :  { %2740 = vmatprep.subr.bf16.mxu1 %v4186_v33  ;;  %v4272_v33 = vld [vmem:[#allocation5 + $0x750] ss:$8 sps:$4 sm:$0xff]  }
  0xe7   :  { %2700 = vmatpush1.bf16.msra.mxu0 %v4181_v34  ;;  %v4277_v34 = vld [vmem:[#allocation5 + $0x644] ss:$8 sps:$4 sm:$0xff]  }
  0xe8   :  { %2741 = vmatpush1.bf16.msra.mxu1 %v4184_v35  ;;  %2701 = vmatprep.subr.bf16.mxu0 %v4189_v36  ;;  %v4280_v35 = vld [vmem:[#allocation5 + $0x744] ss:$8 sps:$4 sm:$0xff]   ;;  %v4275_v36 = vld [vmem:[#allocation5 + $0x640] ss:$8 sps:$4 sm:$0xff]  }
  0xe9   :  { %2742 = vmatprep.subr.bf16.mxu1 %v4192_v37  ;;  %v4278_v37 = vld [vmem:[#allocation5 + $0x740] ss:$8 sps:$4 sm:$0xff]  }
  0xeb   :  { %2702 = vmatpush1.bf16.msra.mxu0 %v4187_v38  ;;  %v4283_v38 = vld [vmem:[#allocation5 + $0x634] ss:$8 sps:$4 sm:$0xff]  }
  0xec   :  { %2743 = vmatpush1.bf16.msra.mxu1 %v4190_v39  ;;  %2703 = vmatprep.subr.bf16.mxu0 %v4195_v40  ;;  %v4286_v39 = vld [vmem:[#allocation5 + $0x734] ss:$8 sps:$4 sm:$0xff]   ;;  %v4281_v40 = vld [vmem:[#allocation5 + $0x630] ss:$8 sps:$4 sm:$0xff]  }
  0xed   :  { %2744 = vmatprep.subr.bf16.mxu1 %v4198_v41  ;;  %v4284_v41 = vld [vmem:[#allocation5 + $0x730] ss:$8 sps:$4 sm:$0xff]  }
  0xef   :  { %2704 = vmatpush1.bf16.msra.mxu0 %v4193_v42  ;;  %v4289_v42 = vld [vmem:[#allocation5 + $0x624] ss:$8 sps:$4 sm:$0xff]  }
  0xf0   :  { %2745 = vmatpush1.bf16.msra.mxu1 %v4196_v43  ;;  %2705 = vmatprep.subr.bf16.mxu0 %v4201_v44  ;;  %v4292_v43 = vld [vmem:[#allocation5 + $0x724] ss:$8 sps:$4 sm:$0xff]   ;;  %v4287_v44 = vld [vmem:[#allocation5 + $0x620] ss:$8 sps:$4 sm:$0xff]  }
  0xf1   :  { %2746 = vmatprep.subr.bf16.mxu1 %v4204_v45  ;;  %v4290_v45 = vld [vmem:[#allocation5 + $0x720] ss:$8 sps:$4 sm:$0xff]  }
  0xf3   :  { %2706 = vmatpush1.bf16.msra.mxu0 %v4199_v46  ;;  %v4295_v46 = vld [vmem:[#allocation5 + $0x614] ss:$8 sps:$4 sm:$0xff]  }
  0xf4   :  { %2747 = vmatpush1.bf16.msra.mxu1 %v4202_v47  ;;  %2707 = vmatprep.subr.bf16.mxu0 %v4207_v48  ;;  %v4298_v47 = vld [vmem:[#allocation5 + $0x714] ss:$8 sps:$4 sm:$0xff]   ;;  %v4293_v48 = vld [vmem:[#allocation5 + $0x610] ss:$8 sps:$4 sm:$0xff]  }
  0xf5   :  { %2748 = vmatprep.subr.bf16.mxu1 %v4210_v49  ;;  %v4296_v49 = vld [vmem:[#allocation5 + $0x710] ss:$8 sps:$4 sm:$0xff]  }
  0xf7   :  { %2708 = vmatpush2.bf16.msra.mxu0 %v4205_v50  ;;  %v4301_v50 = vld [vmem:[#allocation5 + $0x604] ss:$8 sps:$4 sm:$0xff]  }
  0xf8   :  { %2749 = vmatpush2.bf16.msra.mxu1 %v4208_v51  ;;  %2709 = vmatprep.subr.bf16.mxu0 %v4213_v52  ;;  %v4304_v51 = vld [vmem:[#allocation5 + $0x704] ss:$8 sps:$4 sm:$0xff]   ;;  %v4299_v52 = vld [vmem:[#allocation5 + $0x600] ss:$8 sps:$4 sm:$0xff]  }
  0xf9   :  { %2750 = vmatprep.subr.bf16.mxu1 %v4216_v53  ;;  %v4302_v53 = vld [vmem:[#allocation5 + $0x700] ss:$8 sps:$4 sm:$0xff]  }
  0xfb   :  { %2710 = vmatpush2.bf16.msra.mxu0 %v4211_v54  ;;  %v4307_v54 = vld [vmem:[#allocation5 + $0x6f4] ss:$8 sps:$4 sm:$0xff]  }
  0xfc   :  { %2751 = vmatpush2.bf16.msra.mxu1 %v4214_v55  ;;  %2711 = vmatprep.subr.bf16.mxu0 %v4219_v56  ;;  %v4310_v55 = vld [vmem:[#allocation5 + $0x7f4] ss:$8 sps:$4 sm:$0xff]   ;;  %v4305_v56 = vld [vmem:[#allocation5 + $0x6f0] ss:$8 sps:$4 sm:$0xff]  }
  0xfd   :  { %2752 = vmatprep.subr.bf16.mxu1 %v4222_v57  ;;  %v4308_v57 = vld [vmem:[#allocation5 + $0x7f0] ss:$8 sps:$4 sm:$0xff]  }
  0xff   :  { %2712 = vmatpush2.bf16.msra.mxu0 %v4217_v58  ;;  %v4313_v58 = vld [vmem:[#allocation5 + $0x6e4] ss:$8 sps:$4 sm:$0xff]  }
 0x100   :  { %2753 = vmatpush2.bf16.msra.mxu1 %v4220_v59  ;;  %2713 = vmatprep.subr.bf16.mxu0 %v4225_v60  ;;  %v4316_v59 = vld [vmem:[#allocation5 + $0x7e4] ss:$8 sps:$4 sm:$0xff]   ;;  %v4311_v60 = vld [vmem:[#allocation5 + $0x6e0] ss:$8 sps:$4 sm:$0xff]  }
 0x101   :  { %2754 = vmatprep.subr.bf16.mxu1 %v4228_v61  ;;  %v4314_v61 = vld [vmem:[#allocation5 + $0x7e0] ss:$8 sps:$4 sm:$0xff]  }
 0x103   :  { %2714 = vmatpush2.bf16.msra.mxu0 %v4223_v62  ;;  %v4319_v62 = vld [vmem:[#allocation5 + $0x6d4] ss:$8 sps:$4 sm:$0xff]  }
 0x104   :  { %2755 = vmatpush2.bf16.msra.mxu1 %v4226_v63  ;;  %2715 = vmatprep.subr.bf16.mxu0 %v4231_v0  ;;  %v4322_v63 = vld [vmem:[#allocation5 + $0x7d4] ss:$8 sps:$4 sm:$0xff]   ;;  %v4317_v0 = vld [vmem:[#allocation5 + $0x6d0] ss:$8 sps:$4 sm:$0xff]  }
 0x105   :  { %2756 = vmatprep.subr.bf16.mxu1 %v4234_v1  ;;  %v4320_v1 = vld [vmem:[#allocation5 + $0x7d0] ss:$8 sps:$4 sm:$0xff]  }
 0x107   :  { %2716 = vmatpush2.bf16.msra.mxu0 %v4229_v2  ;;  %v4325_v2 = vld [vmem:[#allocation5 + $0x6c4] ss:$8 sps:$4 sm:$0xff]  }
 0x108   :  { %2757 = vmatpush2.bf16.msra.mxu1 %v4232_v3  ;;  %2717 = vmatprep.subr.bf16.mxu0 %v4237_v4  ;;  %v4328_v3 = vld [vmem:[#allocation5 + $0x7c4] ss:$8 sps:$4 sm:$0xff]   ;;  %v4323_v4 = vld [vmem:[#allocation5 + $0x6c0] ss:$8 sps:$4 sm:$0xff]  }
 0x109   :  { %2758 = vmatprep.subr.bf16.mxu1 %v4240_v5  ;;  %v4326_v5 = vld [vmem:[#allocation5 + $0x7c0] ss:$8 sps:$4 sm:$0xff]  }
 0x10b   :  { %2718 = vmatpush2.bf16.msra.mxu0 %v4235_v6  ;;  %v4331_v6 = vld [vmem:[#allocation5 + $0x6b4] ss:$8 sps:$4 sm:$0xff]  }
 0x10c   :  { %2759 = vmatpush2.bf16.msra.mxu1 %v4238_v7  ;;  %2719 = vmatprep.subr.bf16.mxu0 %v4243_v8  ;;  %v4334_v7 = vld [vmem:[#allocation5 + $0x7b4] ss:$8 sps:$4 sm:$0xff]   ;;  %v4329_v8 = vld [vmem:[#allocation5 + $0x6b0] ss:$8 sps:$4 sm:$0xff]  }
 0x10d   :  { %2760 = vmatprep.subr.bf16.mxu1 %v4246_v9  ;;  %v4332_v9 = vld [vmem:[#allocation5 + $0x7b0] ss:$8 sps:$4 sm:$0xff]  }
 0x10f   :  { %2720 = vmatpush2.bf16.msra.mxu0 %v4241_v10  ;;  %v4337_v10 = vld [vmem:[#allocation5 + $0x6a4] ss:$8 sps:$4 sm:$0xff]  }
 0x110   :  { %2761 = vmatpush2.bf16.msra.mxu1 %v4244_v11  ;;  %2721 = vmatprep.subr.bf16.mxu0 %v4249_v12  ;;  %v4340_v11 = vld [vmem:[#allocation5 + $0x7a4] ss:$8 sps:$4 sm:$0xff]   ;;  %v4335_v12 = vld [vmem:[#allocation5 + $0x6a0] ss:$8 sps:$4 sm:$0xff]  }
 0x111   :  { %2762 = vmatprep.subr.bf16.mxu1 %v4252_v13  ;;  %v4338_v13 = vld [vmem:[#allocation5 + $0x7a0] ss:$8 sps:$4 sm:$0xff]  }
 0x113   :  { %2722 = vmatpush2.bf16.msra.mxu0 %v4247_v14  ;;  %v4343_v14 = vld [vmem:[#allocation5 + $0x694] ss:$8 sps:$4 sm:$0xff]  }
 0x114   :  { %2763 = vmatpush2.bf16.msra.mxu1 %v4250_v15  ;;  %2773 = vmatprep.subr.bf16.mxu0 %v4259_v16  ;;  %v513_v15 = vlaneseq  ;;  %v4346_v16 = vld [vmem:[#allocation5 + $0x794] ss:$8 sps:$4 sm:$0xff]  }
 0x115   :  { %2814 = vmatprep.subr.bf16.mxu1 %v4262_v17  ;;  %v4341_v17 = vld [vmem:[#allocation5 + $0x690] ss:$8 sps:$4 sm:$0xff]  }
 0x116   :  { %2724 = vmatmul.mubr.bf16.vlgmr.msra.gmra.mxu0 %v3474_v22  ;;  %v4349_v22 = vld [vmem:[#allocation5 + $0x684] ss:$8 sps:$4 sm:$0xff]  }
 0x117   :  { %2765 = vmatmul.mubr.bf16.vlgmr.msra.gmra.mxu1 %v3476_v23  ;;  %2774 = vmatpush1.bf16.msra.mxu0 %v4257_v20  ;;  %v4344_v20 = vld [vmem:[#allocation5 + $0x790] ss:$8 sps:$4 sm:$0xff]   ;;  %v4896_v23 = vshrl.u32 %v513_v15, 7  ;;  %v4407_v15 = vld [vmem:[#allocation5 + $0x8f4] ss:$8 sps:$4 sm:$0xff]  }
 0x118   :  { %2815 = vmatpush1.bf16.msra.mxu1 %v4260_v25  ;;  %2775 = vmatprep.subr.bf16.mxu0 %v4265_v26  ;;  %v4352_v25 = vld [vmem:[#allocation5 + $0x784] ss:$8 sps:$4 sm:$0xff]   ;;  %v4347_v26 = vld [vmem:[#allocation5 + $0x680] ss:$8 sps:$4 sm:$0xff]  }
 0x119   :  { %2816 = vmatprep.subr.bf16.mxu1 %v4268_v27  ;;  %2805 = vmatprep.mubr.bf16.mxu0 %v3479_v28  ;;  %v4350_v27 = vld [vmem:[#allocation5 + $0x780] ss:$8 sps:$4 sm:$0xff]  }
 0x11a   :  { %2846 = vmatprep.mubr.bf16.mxu1 %v3481_v29  ;;  %v511_v28 = vld [vmem:[#allocation7] sm:$0x3]  ;;  %v515_v29 = vsub.s32 0, %v4896_v23 }
 0x11b   :  { %2776 = vmatpush1.bf16.msra.mxu0 %v4263_v18  ;;  %v4359_v18 = vld [vmem:[#allocation5 + $0x874] ss:$8 sps:$4 sm:$0xff]  }
 0x11c   :  { %2817 = vmatpush1.bf16.msra.mxu1 %v4266_v19  ;;  %2777 = vmatprep.subr.bf16.mxu0 %v4271_v30  ;;  %v4362_v19 = vld [vmem:[#allocation5 + $0x974] ss:$8 sps:$4 sm:$0xff]   ;;  %v4357_v30 = vld [vmem:[#allocation5 + $0x870] ss:$8 sps:$4 sm:$0xff]  }
 0x11d   :  { %2818 = vmatprep.subr.bf16.mxu1 %v4274_v31  ;;  %v519_v31 = vsub.s32 1, %v4896_v23 }
 0x11f   :  { %2778 = vmatpush1.bf16.msra.mxu0 %v4269_v32  ;;  %v3478_v32 = vcombine.low %v4884_v21, %v4884_v21  ;;  %v520_v21 = vrot.slane %v511_v28, %v519_v31 }
 0x120   :  { %2819 = vmatpush1.bf16.msra.mxu1 %v4272_v33  ;;  %2779 = vmatprep.subr.bf16.mxu0 %v4277_v34  ;;  %v3480_v33 = vcombine.low %v4890_v24, %v4890_v24  ;;  %v4904_v34 = vld [vmem:[#allocation2 + $0x40] sm:$0xff] }
 0x121   :  { %2820 = vmatprep.subr.bf16.mxu1 %v4280_v35  ;;  %v4906_v35 = vld [vmem:[#allocation2 + $0x48] sm:$0xff]  ;;  %v3483_v24 = vcombine.high %v4904_v34, %v4904_v34 }
 0x123   :  { %2780 = vmatpush1.bf16.msra.mxu0 %v4275_v36  ;;  %v516_v36 = vrot.slane %v511_v28, %v515_v29  ;;  %v4419_v28 = vld [vmem:[#allocation5 + $0x8d4] ss:$8 sps:$4 sm:$0xff]  }
 0x124   :  { %2821 = vmatpush1.bf16.msra.mxu1 %v4278_v37  ;;  %2781 = vmatprep.subr.bf16.mxu0 %v4283_v38  ;;  %v4360_v37 = vld [vmem:[#allocation5 + $0x970] ss:$8 sps:$4 sm:$0xff]   ;;  %v4365_v38 = vld [vmem:[#allocation5 + $0x864] ss:$8 sps:$4 sm:$0xff]  }
 0x125   :  { %2822 = vmatprep.subr.bf16.mxu1 %v4286_v39  ;;  %v4368_v39 = vld [vmem:[#allocation5 + $0x964] ss:$8 sps:$4 sm:$0xff]  }
 0x127   :  { %2782 = vmatpush1.bf16.msra.mxu0 %v4281_v40  ;;  %v3485_v40 = vcombine.high %v4906_v35, %v4906_v35 }
 0x128   :  { %2823 = vmatpush1.bf16.msra.mxu1 %v4284_v41  ;;  %2783 = vmatprep.subr.bf16.mxu0 %v4289_v42 }
 0x129   :  { %2824 = vmatprep.subr.bf16.mxu1 %v4292_v43  ;;  %v4363_v43 = vld [vmem:[#allocation5 + $0x860] ss:$8 sps:$4 sm:$0xff]  }
 0x12b   :  { %2784 = vmatpush1.bf16.msra.mxu0 %v4287_v44  ;;  %v4366_v44 = vld [vmem:[#allocation5 + $0x960] ss:$8 sps:$4 sm:$0xff]  }
 0x12c   :  { %2825 = vmatpush1.bf16.msra.mxu1 %v4290_v45  ;;  %2785 = vmatprep.subr.bf16.mxu0 %v4295_v46  ;;  %v4371_v45 = vld [vmem:[#allocation5 + $0x854] ss:$8 sps:$4 sm:$0xff]  }
 0x12d   :  { %2826 = vmatprep.subr.bf16.mxu1 %v4298_v47  ;;  %v4374_v47 = vld [vmem:[#allocation5 + $0x954] ss:$8 sps:$4 sm:$0xff]  }
 0x12f   :  { %2786 = vmatpush1.bf16.msra.mxu0 %v4293_v48 }
 0x130   :  { %2827 = vmatpush1.bf16.msra.mxu1 %v4296_v49  ;;  %2787 = vmatprep.subr.bf16.mxu0 %v4301_v50 }
 0x131   :  { %2828 = vmatprep.subr.bf16.mxu1 %v4304_v51 }
 0x133   :  { %2788 = vmatpush1.bf16.msra.mxu0 %v4299_v52  ;;  %v4369_v52 = vld [vmem:[#allocation5 + $0x850] ss:$8 sps:$4 sm:$0xff]  }
 0x134   :  { %2829 = vmatpush1.bf16.msra.mxu1 %v4302_v53  ;;  %2789 = vmatprep.subr.bf16.mxu0 %v4307_v54  ;;  %v4372_v53 = vld [vmem:[#allocation5 + $0x950] ss:$8 sps:$4 sm:$0xff]  }
 0x135   :  { %2830 = vmatprep.subr.bf16.mxu1 %v4310_v55 }
 0x137   :  { %2790 = vmatpush2.bf16.msra.mxu0 %v4305_v56  ;;  %v4377_v56 = vld [vmem:[#allocation5 + $0x844] ss:$8 sps:$4 sm:$0xff]  }
 0x138   :  { %2831 = vmatpush2.bf16.msra.mxu1 %v4308_v57  ;;  %2791 = vmatprep.subr.bf16.mxu0 %v4313_v58  ;;  %v4380_v57 = vld [vmem:[#allocation5 + $0x944] ss:$8 sps:$4 sm:$0xff]  }
 0x139   :  { %2832 = vmatprep.subr.bf16.mxu1 %v4316_v59 }
 0x13b   :  { %2792 = vmatpush2.bf16.msra.mxu0 %v4311_v60 }
 0x13c   :  { %2833 = vmatpush2.bf16.msra.mxu1 %v4314_v61  ;;  %2793 = vmatprep.subr.bf16.mxu0 %v4319_v62  ;;  %v4375_v61 = vld [vmem:[#allocation5 + $0x840] ss:$8 sps:$4 sm:$0xff]  }
 0x13d   :  { %2834 = vmatprep.subr.bf16.mxu1 %v4322_v63  ;;  %v4378_v62 = vld [vmem:[#allocation5 + $0x940] ss:$8 sps:$4 sm:$0xff]   ;;  %v4383_v63 = vld [vmem:[#allocation5 + $0x834] ss:$8 sps:$4 sm:$0xff]  }
 0x13f   :  { %2794 = vmatpush2.bf16.msra.mxu0 %v4317_v0  ;;  %v4386_v0 = vld [vmem:[#allocation5 + $0x934] ss:$8 sps:$4 sm:$0xff]  }
 0x140   :  { %2835 = vmatpush2.bf16.msra.mxu1 %v4320_v1  ;;  %2795 = vmatprep.subr.bf16.mxu0 %v4325_v2  ;;  %v4381_v1 = vld [vmem:[#allocation5 + $0x830] ss:$8 sps:$4 sm:$0xff]  }
 0x141   :  { %2836 = vmatprep.subr.bf16.mxu1 %v4328_v3  ;;  %v4384_v2 = vld [vmem:[#allocation5 + $0x930] ss:$8 sps:$4 sm:$0xff]   ;;  %v4389_v3 = vld [vmem:[#allocation5 + $0x824] ss:$8 sps:$4 sm:$0xff]  }
 0x143   :  { %2796 = vmatpush2.bf16.msra.mxu0 %v4323_v4  ;;  %v4392_v4 = vld [vmem:[#allocation5 + $0x924] ss:$8 sps:$4 sm:$0xff]  }
 0x144   :  { %2837 = vmatpush2.bf16.msra.mxu1 %v4326_v5  ;;  %2797 = vmatprep.subr.bf16.mxu0 %v4331_v6  ;;  %v4387_v5 = vld [vmem:[#allocation5 + $0x820] ss:$8 sps:$4 sm:$0xff]  }
 0x145   :  { %2838 = vmatprep.subr.bf16.mxu1 %v4334_v7  ;;  %v4390_v6 = vld [vmem:[#allocation5 + $0x920] ss:$8 sps:$4 sm:$0xff]   ;;  %v4395_v7 = vld [vmem:[#allocation5 + $0x814] ss:$8 sps:$4 sm:$0xff]  }
 0x147   :  { %2798 = vmatpush2.bf16.msra.mxu0 %v4329_v8  ;;  %v4398_v8 = vld [vmem:[#allocation5 + $0x914] ss:$8 sps:$4 sm:$0xff]  }
 0x148   :  { %2839 = vmatpush2.bf16.msra.mxu1 %v4332_v9  ;;  %2799 = vmatprep.subr.bf16.mxu0 %v4337_v10  ;;  %v4393_v9 = vld [vmem:[#allocation5 + $0x810] ss:$8 sps:$4 sm:$0xff]  }
 0x149   :  { %2840 = vmatprep.subr.bf16.mxu1 %v4340_v11  ;;  %v4396_v10 = vld [vmem:[#allocation5 + $0x910] ss:$8 sps:$4 sm:$0xff]   ;;  %v4401_v11 = vld [vmem:[#allocation5 + $0x804] ss:$8 sps:$4 sm:$0xff]  }
 0x14b   :  { %2800 = vmatpush2.bf16.msra.mxu0 %v4335_v12  ;;  %v4404_v12 = vld [vmem:[#allocation5 + $0x904] ss:$8 sps:$4 sm:$0xff]  }
 0x14c   :  { %2841 = vmatpush2.bf16.msra.mxu1 %v4338_v13  ;;  %2801 = vmatprep.subr.bf16.mxu0 %v4343_v14  ;;  %v4399_v13 = vld [vmem:[#allocation5 + $0x800] ss:$8 sps:$4 sm:$0xff]  }
 0x14d   :  { %2842 = vmatprep.subr.bf16.mxu1 %v4346_v16  ;;  %v4402_v14 = vld [vmem:[#allocation5 + $0x900] ss:$8 sps:$4 sm:$0xff]   ;;  %v4410_v16 = vld [vmem:[#allocation5 + $0x9f4] ss:$8 sps:$4 sm:$0xff]  }
 0x14f   :  { %2802 = vmatpush2.bf16.msra.mxu0 %v4341_v17  ;;  %v4405_v17 = vld [vmem:[#allocation5 + $0x8f0] ss:$8 sps:$4 sm:$0xff]  }
 0x150   :  { %2843 = vmatpush2.bf16.msra.mxu1 %v4344_v20  ;;  %2803 = vmatprep.subr.bf16.mxu0 %v4349_v22  ;;  %v4408_v20 = vld [vmem:[#allocation5 + $0x9f0] ss:$8 sps:$4 sm:$0xff]   ;;  %v4413_v22 = vld [vmem:[#allocation5 + $0x8e4] ss:$8 sps:$4 sm:$0xff]  }
 0x151   :  { %2844 = vmatprep.subr.bf16.mxu1 %v4352_v25  ;;  %v4416_v25 = vld [vmem:[#allocation5 + $0x9e4] ss:$8 sps:$4 sm:$0xff]  }
 0x153   :  { %2804 = vmatpush2.bf16.msra.mxu0 %v4347_v26  ;;  %v4411_v26 = vld [vmem:[#allocation5 + $0x8e0] ss:$8 sps:$4 sm:$0xff]  }
 0x154   :  { %2845 = vmatpush2.bf16.msra.mxu1 %v4350_v27  ;;  %2855 = vmatprep.subr.bf16.mxu0 %v4359_v18  ;;  %v4414_v27 = vld [vmem:[#allocation5 + $0x9e0] ss:$8 sps:$4 sm:$0xff]   ;;  %v4422_v18 = vld [vmem:[#allocation5 + $0x9d4] ss:$8 sps:$4 sm:$0xff]  }
 0x155   :  { %2896 = vmatprep.subr.bf16.mxu1 %v4362_v19  ;;  %v4417_v19 = vld [vmem:[#allocation5 + $0x8d0] ss:$8 sps:$4 sm:$0xff]  }
 0x156   :  { %v2561_v41 = vpop.f32.mrf.mxu0  ;;  %2806 = vmatmul.mubr.bf16.vlgmr.msra.gmra.mxu0 %v3478_v32  ;;  %v4425_v32 = vld [vmem:[#allocation5 + $0x8c4] ss:$8 sps:$4 sm:$0xff]  }
 0x157   :  { %v2602_v42 = vpop.f32.mrf.mxu1  ;;  %2847 = vmatmul.mubr.bf16.vlgmr.msra.gmra.mxu1 %v3480_v33  ;;  %v2562_v46 = vadd.f32 %v2561_v41, %v516_v36  ;;  %2856 = vmatpush1.bf16.msra.mxu0 %v4357_v30  ;;  %v4420_v30 = vld [vmem:[#allocation5 + $0x9d0] ss:$8 sps:$4 sm:$0xff]   ;;  %v4428_v33 = vld [vmem:[#allocation5 + $0x9c4] ss:$8 sps:$4 sm:$0xff]   ;;  %v4423_v36 = vld [vmem:[#allocation5 + $0x8c0] ss:$8 sps:$4 sm:$0xff]  }
 0x158   :  { %2897 = vmatpush1.bf16.msra.mxu1 %v4360_v37  ;;  %v2563_v48 = vpop.f32.mrf.mxu0  ;;  %2857 = vmatprep.subr.bf16.mxu0 %v4365_v38  ;;  %v4426_v37 = vld [vmem:[#allocation5 + $0x9c0] ss:$8 sps:$4 sm:$0xff]   ;;  %v4431_v38 = vld [vmem:[#allocation5 + $0x8b4] ss:$8 sps:$4 sm:$0xff]   ;;  %v4440_v41 = vld [vmem:[#allocation5 + $0x9a4] ss:$8 sps:$4 sm:$0xff]  }
 0x159   :  { %v2604_v49 = vpop.f32.mrf.mxu1  ;;  %2898 = vmatprep.subr.bf16.mxu1 %v4368_v39  ;;  %v4916_v50 = vadd.f32 %v2602_v42, %v2562_v46  ;;  %v2564_v51 = vadd.f32 %v2563_v48, %v520_v21  ;;  %2887 = vmatprep.mubr.bf16.mxu0 %v3483_v24  ;;  %v4434_v39 = vld [vmem:[#allocation5 + $0x9b4] ss:$8 sps:$4 sm:$0xff]   ;;  %v4429_v21 = vld [vmem:[#allocation5 + $0x8b0] ss:$8 sps:$4 sm:$0xff]   ;;  %v4435_v42 = vld [vmem:[#allocation5 + $0x8a0] ss:$8 sps:$4 sm:$0xff]  }
 0x15a   :  { %2928 = vmatprep.mubr.bf16.mxu1 %v3485_v40  ;;  %v2565_v54 = vpop.f32.mrf.mxu0  ;;  %v4432_v24 = vld [vmem:[#allocation5 + $0x9b0] ss:$8 sps:$4 sm:$0xff]   ;;  %v4437_v40 = vld [vmem:[#allocation5 + $0x8a4] ss:$8 sps:$4 sm:$0xff]  }
 0x15b   :  { %v2606_v55 = vpop.f32.mrf.mxu1  ;;  %v4918_v58 = vadd.f32 %v2604_v49, %v2564_v51  ;;  %2858 = vmatpush1.bf16.msra.mxu0 %v4363_v43  ;;  %v4438_v43 = vld [vmem:[#allocation5 + $0x9a0] ss:$8 sps:$4 sm:$0xff]   ;;  %v4441_v46 = vld [vmem:[#allocation5 + $0x890] ss:$8 sps:$4 sm:$0xff]   ;;  %v4449_v48 = vld [vmem:[#allocation5 + $0x884] ss:$8 sps:$4 sm:$0xff]  }
 0x15c   :  { %2899 = vmatpush1.bf16.msra.mxu1 %v4366_v44  ;;  %v2566_v59 = vpop.f32.mrf.mxu0  ;;  %2859 = vmatprep.subr.bf16.mxu0 %v4371_v45  ;;  %v4443_v44 = vld [vmem:[#allocation5 + $0x894] ss:$8 sps:$4 sm:$0xff]   ;;  %v4452_v49 = vld [vmem:[#allocation5 + $0x984] ss:$8 sps:$4 sm:$0xff]   ;;  %v4447_v51 = vld [vmem:[#allocation5 + $0x880] ss:$8 sps:$4 sm:$0xff]   ;;  %v3482_v55 = vcombine.low %v4904_v34, %v4904_v34 }
 0x15d   :  { %v2607_v60 = vpop.f32.mrf.mxu1  ;;  %2900 = vmatprep.subr.bf16.mxu1 %v4374_v47  ;;  %v4446_v45 = vld [vmem:[#allocation5 + $0x994] ss:$8 sps:$4 sm:$0xff]   ;;  %v4444_v47 = vld [vmem:[#allocation5 + $0x990] ss:$8 sps:$4 sm:$0xff]  }
 0x15e   :  { %v4462_v54 = vld [vmem:[#allocation5 + $0xb74] ss:$8 sps:$4 sm:$0xff]   ;;  %v4457_v60 = vld [vmem:[#allocation5 + $0xa70] ss:$8 sps:$4 sm:$0xff]  }
 0x15f   :  { %2860 = vmatpush1.bf16.msra.mxu0 %v4369_v52  ;;  %v4450_v52 = vld [vmem:[#allocation5 + $0x980] ss:$8 sps:$4 sm:$0xff]   ;;  %v4926_v59 = vld [vmem:[#allocation2 + $0x58] sm:$0xff] }
 0x160   :  { %2901 = vmatpush1.bf16.msra.mxu1 %v4372_v53  ;;  %2861 = vmatprep.subr.bf16.mxu0 %v4377_v56  ;;  %v4459_v53 = vld [vmem:[#allocation5 + $0xa74] ss:$8 sps:$4 sm:$0xff]   ;;  %v3484_v56 = vcombine.low %v4906_v35, %v4906_v35  ;;  %v3489_v34 = vcombine.high %v4926_v59, %v4926_v59 }
 0x161   :  { %2902 = vmatprep.subr.bf16.mxu1 %v4380_v57  ;;  %v4924_v57 = vld [vmem:[#allocation2 + $0x50] sm:$0xff] }
 0x163   :  { %2862 = vmatpush1.bf16.msra.mxu0 %v4375_v61  ;;  %v4460_v61 = vld [vmem:[#allocation5 + $0xb70] ss:$8 sps:$4 sm:$0xff]  }
 0x164   :  { %2903 = vmatpush1.bf16.msra.mxu1 %v4378_v62  ;;  %2863 = vmatprep.subr.bf16.mxu0 %v4383_v63  ;;  %v4465_v62 = vld [vmem:[#allocation5 + $0xa64] ss:$8 sps:$4 sm:$0xff]  }
 0x165   :  { %2904 = vmatprep.subr.bf16.mxu1 %v4386_v0  ;;  %v4468_v63 = vld [vmem:[#allocation5 + $0xb64] ss:$8 sps:$4 sm:$0xff]   ;;  %v3487_v0 = vcombine.high %v4924_v57, %v4924_v57 }
 0x167   :  { %2864 = vmatpush1.bf16.msra.mxu0 %v4381_v1 }
 0x168   :  { %2905 = vmatpush1.bf16.msra.mxu1 %v4384_v2  ;;  %2865 = vmatprep.subr.bf16.mxu0 %v4389_v3  ;;  %v4463_v3 = vld [vmem:[#allocation5 + $0xa60] ss:$8 sps:$4 sm:$0xff]  }
 0x169   :  { %2906 = vmatprep.subr.bf16.mxu1 %v4392_v4  ;;  %v4466_v4 = vld [vmem:[#allocation5 + $0xb60] ss:$8 sps:$4 sm:$0xff]  }
 0x16b   :  { %2866 = vmatpush1.bf16.msra.mxu0 %v4387_v5 }
 0x16c   :  { %2907 = vmatpush1.bf16.msra.mxu1 %v4390_v6  ;;  %2867 = vmatprep.subr.bf16.mxu0 %v4395_v7  ;;  %v4471_v7 = vld [vmem:[#allocation5 + $0xa54] ss:$8 sps:$4 sm:$0xff]  }
 0x16d   :  { %2908 = vmatprep.subr.bf16.mxu1 %v4398_v8  ;;  %v4474_v8 = vld [vmem:[#allocation5 + $0xb54] ss:$8 sps:$4 sm:$0xff]  }
 0x16f   :  { %2868 = vmatpush1.bf16.msra.mxu0 %v4393_v9 }
 0x170   :  { %2909 = vmatpush1.bf16.msra.mxu1 %v4396_v10  ;;  %2869 = vmatprep.subr.bf16.mxu0 %v4401_v11 }
 0x171   :  { %2910 = vmatprep.subr.bf16.mxu1 %v4404_v12 }
 0x173   :  { %2870 = vmatpush1.bf16.msra.mxu0 %v4399_v13 }
 0x174   :  { %2911 = vmatpush1.bf16.msra.mxu1 %v4402_v14  ;;  %2871 = vmatprep.subr.bf16.mxu0 %v4407_v15  ;;  %v4472_v14 = vld [vmem:[#allocation5 + $0xb50] ss:$8 sps:$4 sm:$0xff]  }
 0x175   :  { %2912 = vmatprep.subr.bf16.mxu1 %v4410_v16 }
 0x177   :  { %2872 = vmatpush2.bf16.msra.mxu0 %v4405_v17  ;;  %v4477_v17 = vld [vmem:[#allocation5 + $0xa44] ss:$8 sps:$4 sm:$0xff]  }
 0x178   :  { %2913 = vmatpush2.bf16.msra.mxu1 %v4408_v20  ;;  %2873 = vmatprep.subr.bf16.mxu0 %v4413_v22  ;;  %v4480_v20 = vld [vmem:[#allocation5 + $0xb44] ss:$8 sps:$4 sm:$0xff]   ;;  %v4475_v22 = vld [vmem:[#allocation5 + $0xa40] ss:$8 sps:$4 sm:$0xff]  }
 0x179   :  { %2914 = vmatprep.subr.bf16.mxu1 %v4416_v25  ;;  %v4483_v25 = vld [vmem:[#allocation5 + $0xa34] ss:$8 sps:$4 sm:$0xff]  }
 0x17b   :  { %2874 = vmatpush2.bf16.msra.mxu0 %v4411_v26  ;;  %v4486_v26 = vld [vmem:[#allocation5 + $0xb34] ss:$8 sps:$4 sm:$0xff]  }
 0x17c   :  { %2915 = vmatpush2.bf16.msra.mxu1 %v4414_v27  ;;  %2875 = vmatprep.subr.bf16.mxu0 %v4419_v28  ;;  %v4481_v27 = vld [vmem:[#allocation5 + $0xa30] ss:$8 sps:$4 sm:$0xff]  }
 0x17d   :  { %2916 = vmatprep.subr.bf16.mxu1 %v4422_v18  ;;  %v4484_v28 = vld [vmem:[#allocation5 + $0xb30] ss:$8 sps:$4 sm:$0xff]   ;;  %v4489_v18 = vld [vmem:[#allocation5 + $0xa24] ss:$8 sps:$4 sm:$0xff]  }
 0x17f   :  { %2876 = vmatpush2.bf16.msra.mxu0 %v4417_v19  ;;  %v4492_v19 = vld [vmem:[#allocation5 + $0xb24] ss:$8 sps:$4 sm:$0xff]  }
 0x180   :  { %2917 = vmatpush2.bf16.msra.mxu1 %v4420_v30  ;;  %2877 = vmatprep.subr.bf16.mxu0 %v4425_v32  ;;  %v4487_v30 = vld [vmem:[#allocation5 + $0xa20] ss:$8 sps:$4 sm:$0xff]  }
 0x181   :  { %2918 = vmatprep.subr.bf16.mxu1 %v4428_v33  ;;  %v4490_v32 = vld [vmem:[#allocation5 + $0xb20] ss:$8 sps:$4 sm:$0xff]   ;;  %v4495_v33 = vld [vmem:[#allocation5 + $0xa14] ss:$8 sps:$4 sm:$0xff]  }
 0x183   :  { %2878 = vmatpush2.bf16.msra.mxu0 %v4423_v36  ;;  %v4498_v36 = vld [vmem:[#allocation5 + $0xb14] ss:$8 sps:$4 sm:$0xff]  }
 0x184   :  { %2919 = vmatpush2.bf16.msra.mxu1 %v4426_v37  ;;  %2879 = vmatprep.subr.bf16.mxu0 %v4431_v38  ;;  %v4493_v37 = vld [vmem:[#allocation5 + $0xa10] ss:$8 sps:$4 sm:$0xff]  }
 0x185   :  { %2920 = vmatprep.subr.bf16.mxu1 %v4434_v39  ;;  %v4496_v38 = vld [vmem:[#allocation5 + $0xb10] ss:$8 sps:$4 sm:$0xff]   ;;  %v4501_v39 = vld [vmem:[#allocation5 + $0xa04] ss:$8 sps:$4 sm:$0xff]  }
 0x187   :  { %2880 = vmatpush2.bf16.msra.mxu0 %v4429_v21  ;;  %v4504_v21 = vld [vmem:[#allocation5 + $0xb04] ss:$8 sps:$4 sm:$0xff]  }
 0x188   :  { %2921 = vmatpush2.bf16.msra.mxu1 %v4432_v24  ;;  %2881 = vmatprep.subr.bf16.mxu0 %v4437_v40  ;;  %v4499_v24 = vld [vmem:[#allocation5 + $0xa00] ss:$8 sps:$4 sm:$0xff]  }
 0x189   :  { %2922 = vmatprep.subr.bf16.mxu1 %v4440_v41  ;;  %v4502_v40 = vld [vmem:[#allocation5 + $0xb00] ss:$8 sps:$4 sm:$0xff]   ;;  %v4507_v41 = vld [vmem:[#allocation5 + $0xaf4] ss:$8 sps:$4 sm:$0xff]  }
 0x18b   :  { %2882 = vmatpush2.bf16.msra.mxu0 %v4435_v42  ;;  %v4510_v42 = vld [vmem:[#allocation5 + $0xbf4] ss:$8 sps:$4 sm:$0xff]  }
 0x18c   :  { %2923 = vmatpush2.bf16.msra.mxu1 %v4438_v43  ;;  %2883 = vmatprep.subr.bf16.mxu0 %v4443_v44  ;;  %v4505_v43 = vld [vmem:[#allocation5 + $0xaf0] ss:$8 sps:$4 sm:$0xff]  }
 0x18d   :  { %2924 = vmatprep.subr.bf16.mxu1 %v4446_v45  ;;  %v4508_v44 = vld [vmem:[#allocation5 + $0xbf0] ss:$8 sps:$4 sm:$0xff]   ;;  %v4513_v45 = vld [vmem:[#allocation5 + $0xae4] ss:$8 sps:$4 sm:$0xff]  }
 0x18f   :  { %2884 = vmatpush2.bf16.msra.mxu0 %v4441_v46  ;;  %v4516_v46 = vld [vmem:[#allocation5 + $0xbe4] ss:$8 sps:$4 sm:$0xff]  }
 0x190   :  { %2925 = vmatpush2.bf16.msra.mxu1 %v4444_v47  ;;  %2885 = vmatprep.subr.bf16.mxu0 %v4449_v48  ;;  %v4511_v47 = vld [vmem:[#allocation5 + $0xae0] ss:$8 sps:$4 sm:$0xff]  }
 0x191   :  { %2926 = vmatprep.subr.bf16.mxu1 %v4452_v49  ;;  %v4514_v48 = vld [vmem:[#allocation5 + $0xbe0] ss:$8 sps:$4 sm:$0xff]   ;;  %v4519_v49 = vld [vmem:[#allocation5 + $0xad4] ss:$8 sps:$4 sm:$0xff]  }
 0x193   :  { %2886 = vmatpush2.bf16.msra.mxu0 %v4447_v51  ;;  %v4522_v51 = vld [vmem:[#allocation5 + $0xbd4] ss:$8 sps:$4 sm:$0xff]  }
 0x194   :  { %2927 = vmatpush2.bf16.msra.mxu1 %v4450_v52  ;;  %2937 = vmatprep.subr.bf16.mxu0 %v4459_v53  ;;  %v4517_v52 = vld [vmem:[#allocation5 + $0xad0] ss:$8 sps:$4 sm:$0xff]  }
 0x195   :  { %2978 = vmatprep.subr.bf16.mxu1 %v4462_v54  ;;  %v4520_v53 = vld [vmem:[#allocation5 + $0xbd0] ss:$8 sps:$4 sm:$0xff]   ;;  %v4525_v54 = vld [vmem:[#allocation5 + $0xac4] ss:$8 sps:$4 sm:$0xff]  }
 0x196   :  { %v2643_v1 = vpop.f32.mrf.mxu0  ;;  %2888 = vmatmul.mubr.bf16.vlgmr.msra.gmra.mxu0 %v3482_v55  ;;  %v4528_v55 = vld [vmem:[#allocation5 + $0xbc4] ss:$8 sps:$4 sm:$0xff]  }
 0x197   :  { %v2684_v35 = vpop.f32.mrf.mxu1  ;;  %2929 = vmatmul.mubr.bf16.vlgmr.msra.gmra.mxu1 %v3484_v56  ;;  %v2644_v2 = vadd.f32 %v2643_v1, %v4916_v50  ;;  %2938 = vmatpush1.bf16.msra.mxu0 %v4457_v60  ;;  %v4469_v50 = vld [vmem:[#allocation5 + $0xa50] ss:$8 sps:$4 sm:$0xff]   ;;  %v4523_v56 = vld [vmem:[#allocation5 + $0xac0] ss:$8 sps:$4 sm:$0xff]   ;;  %v4540_v1 = vld [vmem:[#allocation5 + $0xba4] ss:$8 sps:$4 sm:$0xff]  }
 0x198   :  { %2979 = vmatpush1.bf16.msra.mxu1 %v4460_v61  ;;  %v2645_v5 = vpop.f32.mrf.mxu0  ;;  %2939 = vmatprep.subr.bf16.mxu0 %v4465_v62  ;;  %v4526_v60 = vld [vmem:[#allocation5 + $0xbc0] ss:$8 sps:$4 sm:$0xff]   ;;  %v4531_v61 = vld [vmem:[#allocation5 + $0xab4] ss:$8 sps:$4 sm:$0xff]  }
 0x199   :  { %v2686_v6 = vpop.f32.mrf.mxu1  ;;  %2980 = vmatprep.subr.bf16.mxu1 %v4468_v63  ;;  %v4933_v9 = vadd.f32 %v2684_v35, %v2644_v2  ;;  %v2646_v10 = vadd.f32 %v2645_v5, %v4918_v58  ;;  %2969 = vmatprep.mubr.bf16.mxu0 %v3487_v0  ;;  %v4478_v58 = vld [vmem:[#allocation5 + $0xb40] ss:$8 sps:$4 sm:$0xff]   ;;  %v4534_v62 = vld [vmem:[#allocation5 + $0xbb4] ss:$8 sps:$4 sm:$0xff]   ;;  %v4529_v63 = vld [vmem:[#allocation5 + $0xab0] ss:$8 sps:$4 sm:$0xff]  }
 0x19a   :  { %3010 = vmatprep.mubr.bf16.mxu1 %v3489_v34  ;;  %v2647_v11 = vpop.f32.mrf.mxu0  ;;  %v4532_v0 = vld [vmem:[#allocation5 + $0xbb0] ss:$8 sps:$4 sm:$0xff]   ;;  %v4537_v34 = vld [vmem:[#allocation5 + $0xaa4] ss:$8 sps:$4 sm:$0xff]   ;;  %v4535_v35 = vld [vmem:[#allocation5 + $0xaa0] ss:$8 sps:$4 sm:$0xff]  }
 0x19b   :  { %v2688_v12 = vpop.f32.mrf.mxu1  ;;  %v4936_v13 = vadd.f32 %v2686_v6, %v2646_v10  ;;  %2940 = vmatpush1.bf16.msra.mxu0 %v4463_v3  ;;  %v4538_v2 = vld [vmem:[#allocation5 + $0xba0] ss:$8 sps:$4 sm:$0xff]   ;;  %v4543_v3 = vld [vmem:[#allocation5 + $0xa94] ss:$8 sps:$4 sm:$0xff]   ;;  %v4541_v5 = vld [vmem:[#allocation5 + $0xa90] ss:$8 sps:$4 sm:$0xff]  }
 0x19c   :  { %2981 = vmatpush1.bf16.msra.mxu1 %v4466_v4  ;;  %v2648_v15 = vpop.f32.mrf.mxu0  ;;  %2941 = vmatprep.subr.bf16.mxu0 %v4471_v7  ;;  %v4546_v4 = vld [vmem:[#allocation5 + $0xb94] ss:$8 sps:$4 sm:$0xff]   ;;  %v4544_v6 = vld [vmem:[#allocation5 + $0xb90] ss:$8 sps:$4 sm:$0xff]   ;;  %v4549_v7 = vld [vmem:[#allocation5 + $0xa84] ss:$8 sps:$4 sm:$0xff]   ;;  %v3486_v12 = vcombine.low %v4924_v57, %v4924_v57 }
 0x19d   :  { %v2689_v16 = vpop.f32.mrf.mxu1  ;;  %2982 = vmatprep.subr.bf16.mxu1 %v4474_v8  ;;  %v4552_v8 = vld [vmem:[#allocation5 + $0xb84] ss:$8 sps:$4 sm:$0xff]   ;;  %v4547_v10 = vld [vmem:[#allocation5 + $0xa80] ss:$8 sps:$4 sm:$0xff]  }
 0x19e   :  { %v4550_v11 = vld [vmem:[#allocation5 + $0xb80] ss:$8 sps:$4 sm:$0xff]  }
 0x19f   :  { %2942 = vmatpush1.bf16.msra.mxu0 %v4469_v50  ;;  %v3488_v50 = vcombine.low %v4926_v59, %v4926_v59 }
 0x1a0   :  { %2983 = vmatpush1.bf16.msra.mxu1 %v4472_v14  ;;  %2943 = vmatprep.subr.bf16.mxu0 %v4477_v17 }
 0x1a1   :  { %2984 = vmatprep.subr.bf16.mxu1 %v4480_v20 }
 0x1a3   :  { %2944 = vmatpush1.bf16.msra.mxu0 %v4475_v22 }
 0x1a4   :  { %2985 = vmatpush1.bf16.msra.mxu1 %v4478_v58  ;;  %2945 = vmatprep.subr.bf16.mxu0 %v4483_v25 }
 0x1a5   :  { %2986 = vmatprep.subr.bf16.mxu1 %v4486_v26 }
 0x1a7   :  { %2946 = vmatpush1.bf16.msra.mxu0 %v4481_v27 }
 0x1a8   :  { %2987 = vmatpush1.bf16.msra.mxu1 %v4484_v28  ;;  %2947 = vmatprep.subr.bf16.mxu0 %v4489_v18  ;;  %v4557_v28 = vld [vmem:[#allocation8 + $0x70] ss:$8 sps:$4 sm:$0xff]   ;;  %v4559_v18 = vld [vmem:[#allocation8 + $0x74] ss:$8 sps:$4 sm:$0xff]  }
 0x1a9   :  { %2988 = vmatprep.subr.bf16.mxu1 %v4492_v19  ;;  %v4562_v19 = vld [vmem:[#allocation8 + $0x64] ss:$8 sps:$4 sm:$0xff]  }
 0x1ab   :  { %2948 = vmatpush1.bf16.msra.mxu0 %v4487_v30  ;;  %v4560_v30 = vld [vmem:[#allocation8 + $0x60] ss:$8 sps:$4 sm:$0xff]  }
 0x1ac   :  { %2989 = vmatpush1.bf16.msra.mxu1 %v4490_v32  ;;  %2949 = vmatprep.subr.bf16.mxu0 %v4495_v33  ;;  %v4563_v32 = vld [vmem:[#allocation8 + $0x50] ss:$8 sps:$4 sm:$0xff]   ;;  %v4568_v33 = vld [vmem:[#allocation8 + $0x44] ss:$8 sps:$4 sm:$0xff]  }
 0x1ad   :  { %2990 = vmatprep.subr.bf16.mxu1 %v4498_v36  ;;  %v4571_v36 = vld [vmem:[#allocation8 + $0x34] ss:$8 sps:$4 sm:$0xff]  }
 0x1af   :  { %2950 = vmatpush1.bf16.msra.mxu0 %v4493_v37  ;;  %v4569_v37 = vld [vmem:[#allocation8 + $0x30] ss:$8 sps:$4 sm:$0xff]  }
 0x1b0   :  { %2991 = vmatpush1.bf16.msra.mxu1 %v4496_v38  ;;  %2951 = vmatprep.subr.bf16.mxu0 %v4501_v39  ;;  %v4574_v38 = vld [vmem:[#allocation8 + $0x24] ss:$8 sps:$4 sm:$0xff]   ;;  %v4572_v39 = vld [vmem:[#allocation8 + $0x20] ss:$8 sps:$4 sm:$0xff]  }
 0x1b1   :  { %2992 = vmatprep.subr.bf16.mxu1 %v4504_v21  ;;  %v4577_v21 = vld [vmem:[#allocation8 + $0x14] ss:$8 sps:$4 sm:$0xff]  }
 0x1b3   :  { %2952 = vmatpush1.bf16.msra.mxu0 %v4499_v24  ;;  %v4575_v24 = vld [vmem:[#allocation8 + $0x10] ss:$8 sps:$4 sm:$0xff]  }
 0x1b4   :  { %2993 = vmatpush1.bf16.msra.mxu1 %v4502_v40  ;;  %2953 = vmatprep.subr.bf16.mxu0 %v4507_v41  ;;  %v4580_v40 = vld [vmem:[#allocation8 + $0x4] ss:$8 sps:$4 sm:$0xff]   ;;  %v4578_v41 = vld [vmem:[#allocation8] ss:$8 sps:$4 sm:$0xff]  }
 0x1b5   :  { %2994 = vmatprep.subr.bf16.mxu1 %v4510_v42  ;;  %v4583_v42 = vld [vmem:[#allocation8 + $0xf4] ss:$8 sps:$4 sm:$0xff]  }
 0x1b7   :  { %2954 = vmatpush2.bf16.msra.mxu0 %v4505_v43  ;;  %v4581_v43 = vld [vmem:[#allocation8 + $0xf0] ss:$8 sps:$4 sm:$0xff]  }
 0x1b8   :  { %2995 = vmatpush2.bf16.msra.mxu1 %v4508_v44  ;;  %2955 = vmatprep.subr.bf16.mxu0 %v4513_v45  ;;  %v4586_v44 = vld [vmem:[#allocation8 + $0xe4] ss:$8 sps:$4 sm:$0xff]   ;;  %v4584_v45 = vld [vmem:[#allocation8 + $0xe0] ss:$8 sps:$4 sm:$0xff]  }
 0x1b9   :  { %2996 = vmatprep.subr.bf16.mxu1 %v4516_v46  ;;  %v4589_v46 = vld [vmem:[#allocation8 + $0xd4] ss:$8 sps:$4 sm:$0xff]  }
 0x1bb   :  { %2956 = vmatpush2.bf16.msra.mxu0 %v4511_v47  ;;  %v4587_v47 = vld [vmem:[#allocation8 + $0xd0] ss:$8 sps:$4 sm:$0xff]  }
 0x1bc   :  { %2997 = vmatpush2.bf16.msra.mxu1 %v4514_v48  ;;  %2957 = vmatprep.subr.bf16.mxu0 %v4519_v49  ;;  %v4592_v48 = vld [vmem:[#allocation8 + $0xc4] ss:$8 sps:$4 sm:$0xff]   ;;  %v4590_v49 = vld [vmem:[#allocation8 + $0xc0] ss:$8 sps:$4 sm:$0xff]  }
 0x1bd   :  { %2998 = vmatprep.subr.bf16.mxu1 %v4522_v51  ;;  %v4595_v51 = vld [vmem:[#allocation8 + $0xb4] ss:$8 sps:$4 sm:$0xff]  }
 0x1bf   :  { %2958 = vmatpush2.bf16.msra.mxu0 %v4517_v52  ;;  %v4593_v52 = vld [vmem:[#allocation8 + $0xb0] ss:$8 sps:$4 sm:$0xff]  }
 0x1c0   :  { %2999 = vmatpush2.bf16.msra.mxu1 %v4520_v53  ;;  %2959 = vmatprep.subr.bf16.mxu0 %v4525_v54  ;;  %v4598_v53 = vld [vmem:[#allocation8 + $0xa4] ss:$8 sps:$4 sm:$0xff]   ;;  %v4596_v54 = vld [vmem:[#allocation8 + $0xa0] ss:$8 sps:$4 sm:$0xff]  }
 0x1c1   :  { %3000 = vmatprep.subr.bf16.mxu1 %v4528_v55 }
 0x1c3   :  { %2960 = vmatpush2.bf16.msra.mxu0 %v4523_v56 }
 0x1c4   :  { %3001 = vmatpush2.bf16.msra.mxu1 %v4526_v60  ;;  %2961 = vmatprep.subr.bf16.mxu0 %v4531_v61 }
 0x1c5   :  { %3002 = vmatprep.subr.bf16.mxu1 %v4534_v62 }
 0x1c7   :  { %2962 = vmatpush2.bf16.msra.mxu0 %v4529_v63  ;;  %v4601_v63 = vld [vmem:[#allocation8 + $0x94] ss:$8 sps:$4 sm:$0xff]  }
 0x1c8   :  { %3003 = vmatpush2.bf16.msra.mxu1 %v4532_v0  ;;  %2963 = vmatprep.subr.bf16.mxu0 %v4537_v34 }
 0x1c9   :  { %3004 = vmatprep.subr.bf16.mxu1 %v4540_v1  ;;  %v4599_v1 = vld [vmem:[#allocation8 + $0x90] ss:$8 sps:$4 sm:$0xff]  }
 0x1cb   :  { %2964 = vmatpush2.bf16.msra.mxu0 %v4535_v35 }
 0x1cc   :  { %3005 = vmatpush2.bf16.msra.mxu1 %v4538_v2  ;;  %2965 = vmatprep.subr.bf16.mxu0 %v4543_v3 }
 0x1cd   :  { %3006 = vmatprep.subr.bf16.mxu1 %v4546_v4 }
 0x1cf   :  { %2966 = vmatpush2.bf16.msra.mxu0 %v4541_v5 }
 0x1d0   :  { %3007 = vmatpush2.bf16.msra.mxu1 %v4544_v6  ;;  %2967 = vmatprep.subr.bf16.mxu0 %v4549_v7  ;;  %v4604_v6 = vld [vmem:[#allocation8 + $0x84] ss:$8 sps:$4 sm:$0xff]   ;;  %v4602_v7 = vld [vmem:[#allocation8 + $0x80] ss:$8 sps:$4 sm:$0xff]  }
 0x1d1   :  { %3008 = vmatprep.subr.bf16.mxu1 %v4552_v8  ;;  %v4605_v8 = vld [vmem:[#allocation11 + $0x78] sm:$0xff]  }
 0x1d3   :  { %2968 = vmatpush2.bf16.msra.mxu0 %v4547_v10  ;;  %v4606_v10 = vld [vmem:[#allocation11 + $0x38] sm:$0xff]  }
 0x1d4   :  { %3009 = vmatpush2.bf16.msra.mxu1 %v4550_v11  ;;  %3227 = vmatprep.subr.bf16.mxu0 %v4559_v18  ;;  %v4607_v11 = vld [vmem:[#allocation11 + $0x70] sm:$0xff]  }
 0x1d5   :  { %3923 = vmatprep.subr.bf16.mxu1 %v4605_v8 }
 0x1d6   :  { %v2725_v14 = vpop.f32.mrf.mxu0  ;;  %2970 = vmatmul.mubr.bf16.vlgmr.msra.gmra.mxu0 %v3486_v12  ;;  %v4608_v12 = vld [vmem:[#allocation11 + $0x30] sm:$0xff]  }
 0x1d7   :  { %v2766_v15 = vpop.f32.mrf.mxu1  ;;  %3011 = vmatmul.mubr.bf16.vlgmr.msra.gmra.mxu1 %v3488_v50  ;;  %v2726_v16 = vadd.f32 %v2725_v14, %v4933_v9  ;;  %3228 = vmatpush1.bf16.msra.mxu0 %v4557_v28  ;;  %v4565_v9 = vld [vmem:[#allocation8 + $0x54] ss:$8 sps:$4 sm:$0xff]   ;;  %v4609_v50 = vld [vmem:[#allocation11 + $0x68] sm:$0xff]  }
 0x1d8   :  { %v2727_v17 = vpop.f32.mrf.mxu0  ;;  %3229 = vmatprep.subr.bf16.mxu0 %v4562_v19  ;;  %3924 = vmatpush3.bf16.msra.mxu1 %v4606_v10  ;;  %v4610_v14 = vld [vmem:[#allocation11 + $0x28] sm:$0xff]  }
 0x1d9   :  { %v2768_v20 = vpop.f32.mrf.mxu1  ;;  %v4943_v22 = vadd.f32 %v2766_v15, %v2726_v16  ;;  %v2728_v58 = vadd.f32 %v2727_v17, %v4936_v13  ;;  %v4566_v13 = vld [vmem:[#allocation8 + $0x40] ss:$8 sps:$4 sm:$0xff]   ;;  %3925 = vmatprep.subr.bf16.mxu1 %v4607_v11 }
 0x1da   :  { %v2729_v25 = vpop.f32.mrf.mxu0  ;;  %v4611_v15 = vld [vmem:[#allocation11 + $0x60] sm:$0xff]   ;;  %v4613_v17 = vld [vmem:[#allocation11 + $0x58] sm:$0xff]  }
 0x1db   :  { %v2770_v26 = vpop.f32.mrf.mxu1  ;;  %v4946_v57 = vadd.f32 %v2768_v20, %v2728_v58  ;;  %3230 = vmatpush1.bf16.msra.mxu0 %v4560_v30  ;;  %v4612_v16 = vld [vmem:[#allocation11 + $0x20] sm:$0xff]   ;;  %v4614_v20 = vld [vmem:[#allocation11 + $0x18] sm:$0xff]   ;;  %v4616_v58 = vld [vmem:[#allocation11 + $0x10] sm:$0xff]  }
 0x1dc   :  { %v2730_v27 = vpop.f32.mrf.mxu0  ;;  %3231 = vmatprep.subr.bf16.mxu0 %v4565_v9  ;;  %3926 = vmatpush3.bf16.msra.mxu1 %v4608_v12 }
 0x1dd   :  { %v2771_v59 = vpop.f32.mrf.mxu1  ;;  %3927 = vmatprep.subr.bf16.mxu1 %v4609_v50 }
 0x1df   :  { %3232 = vmatpush1.bf16.msra.mxu0 %v4563_v32 }
 0x1e0   :  { %3233 = vmatprep.subr.bf16.mxu0 %v4568_v33  ;;  %3928 = vmatpush3.bf16.msra.mxu1 %v4610_v14 }
 0x1e1   :  { %3929 = vmatprep.subr.bf16.mxu1 %v4611_v15 }
 0x1e3   :  { %3234 = vmatpush1.bf16.msra.mxu0 %v4566_v13 }
 0x1e4   :  { %3235 = vmatprep.subr.bf16.mxu0 %v4571_v36  ;;  %3930 = vmatpush3.bf16.msra.mxu1 %v4612_v16 }
 0x1e5   :  { %3931 = vmatprep.subr.bf16.mxu1 %v4613_v17 }
 0x1e7   :  { %3236 = vmatpush1.bf16.msra.mxu0 %v4569_v37 }
 0x1e8   :  { %3237 = vmatprep.subr.bf16.mxu0 %v4574_v38  ;;  %3932 = vmatpush3.bf16.msra.mxu1 %v4614_v20 }
 0x1eb   :  { %3238 = vmatpush1.bf16.msra.mxu0 %v4572_v39 }
 0x1ec   :  { %3239 = vmatprep.subr.bf16.mxu0 %v4577_v21 }
 0x1ef   :  { %3240 = vmatpush1.bf16.msra.mxu0 %v4575_v24 }
 0x1f0   :  { %3241 = vmatprep.subr.bf16.mxu0 %v4580_v40 }
 0x1f3   :  { %3242 = vmatpush1.bf16.msra.mxu0 %v4578_v41 }
 0x1f4   :  { %3243 = vmatprep.subr.bf16.mxu0 %v4583_v42 }
 0x1f7   :  { %3244 = vmatpush2.bf16.msra.mxu0 %v4581_v43 }
 0x1f8   :  { %3245 = vmatprep.subr.bf16.mxu0 %v4586_v44 }
 0x1fb   :  { %3246 = vmatpush2.bf16.msra.mxu0 %v4584_v45 }
 0x1fc   :  { %3247 = vmatprep.subr.bf16.mxu0 %v4589_v46 }
 0x1ff   :  { %3248 = vmatpush2.bf16.msra.mxu0 %v4587_v47 }
 0x200   :  { %3249 = vmatprep.subr.bf16.mxu0 %v4592_v48 }
 0x203   :  { %3250 = vmatpush2.bf16.msra.mxu0 %v4590_v49  ;;  %v4617_v49 = vld [vmem:[#allocation11 + $0x48] sm:$0xff]  }
 0x204   :  { %3251 = vmatprep.subr.bf16.mxu0 %v4595_v51  ;;  %v4618_v51 = vld [vmem:[#allocation11 + $0x8] sm:$0xff]  }
 0x207   :  { %3252 = vmatpush2.bf16.msra.mxu0 %v4593_v52  ;;  %v4619_v52 = vld [vmem:[#allocation11 + $0x40] sm:$0xff]  }
 0x208   :  { %3253 = vmatprep.subr.bf16.mxu0 %v4598_v53  ;;  %v4620_v53 = vld [vmem:[#allocation11] sm:$0xff]  }
 0x20b   :  { %3254 = vmatpush2.bf16.msra.mxu0 %v4596_v54  ;;  %v3055_v54 = vld [vmem:[#allocation10] sm:$0x3] }
 0x20c   :  { %3255 = vmatprep.subr.bf16.mxu0 %v4601_v63 }
 0x20f   :  { %3256 = vmatpush2.bf16.msra.mxu0 %v4599_v1 }
 0x210   :  { %3257 = vmatprep.subr.bf16.mxu0 %v4604_v6 }
 0x213   :  { %3258 = vmatpush2.bf16.msra.mxu0 %v4602_v7 }
 0x216   :  { %v2807_v55 = vpop.f32.mrf.mxu0 }
 0x217   :  { %v2848_v56 = vpop.f32.mrf.mxu1  ;;  %v2808_v60 = vadd.f32 %v2807_v55, %v4943_v22  ;;  %v4615_v22 = vld [vmem:[#allocation11 + $0x50] sm:$0xff]   ;;  %v3060_v55 = vrot.slane %v3055_v54, %v515_v29 }
 0x218   :  { %v2809_v61 = vpop.f32.mrf.mxu0  ;;  %3933 = vmatprep.subr.bf16.mxu1 %v4615_v22 }
 0x219   :  { %v2850_v62 = vpop.f32.mrf.mxu1  ;;  %v2849_v0 = vadd.f32 %v2848_v56, %v2808_v60  ;;  %v2810_v34 = vadd.f32 %v2809_v61, %v4946_v57  ;;  %3934 = vmatpush3.bf16.msra.mxu1 %v4616_v58  ;;  %v3064_v56 = vrot.slane %v3055_v54, %v519_v31 }
 0x21a   :  { %v2811_v35 = vpop.f32.mrf.mxu0  ;;  %3935 = vmatprep.subr.bf16.mxu1 %v4617_v49 }
 0x21b   :  { %v2852_v2 = vpop.f32.mrf.mxu1  ;;  %v2851_v3 = vadd.f32 %v2850_v62, %v2810_v34 }
 0x21c   :  { %v2812_v4 = vpop.f32.mrf.mxu0 }
 0x21d   :  { %v2853_v5 = vpop.f32.mrf.mxu1  ;;  %3936 = vmatpush3.bf16.msra.mxu1 %v4618_v51 }
 0x21e   :  { %3937 = vmatprep.subr.bf16.mxu1 %v4619_v52  ;;  %v3906_v5 = vld [vmem:[#allocation13] ss:$0 sm:$0xff] }
 0x221   :  { %3938 = vmatpush3.bf16.msra.mxu1 %v4620_v53 }
 0x256   :  { %v2889_v25 = vpop.f32.mrf.mxu0 }
 0x257   :  { %v2930_v26 = vpop.f32.mrf.mxu1  ;;  %v2890_v57 = vadd.f32 %v2889_v25, %v2849_v0 }
 0x258   :  { %v2891_v27 = vpop.f32.mrf.mxu0 }
 0x259   :  { %v2932_v59 = vpop.f32.mrf.mxu1  ;;  %v2931_v28 = vadd.f32 %v2930_v26, %v2890_v57  ;;  %v2892_v32 = vadd.f32 %v2891_v27, %v2851_v3 }
 0x25a   :  { %v2893_v18 = vpop.f32.mrf.mxu0 }
 0x25b   :  { %v2934_v19 = vpop.f32.mrf.mxu1  ;;  %v2933_v36 = vadd.f32 %v2932_v59, %v2892_v32 }
 0x25c   :  { %v2894_v30 = vpop.f32.mrf.mxu0 }
 0x25d   :  { %v2935_v9 = vpop.f32.mrf.mxu1 }
 0x296   :  { %v2971_v33 = vpop.f32.mrf.mxu0 }
 0x297   :  { %v3012_v13 = vpop.f32.mrf.mxu1  ;;  %v2972_v37 = vadd.f32 %v2971_v33, %v2931_v28 }
 0x298   :  { %v2973_v38 = vpop.f32.mrf.mxu0 }
 0x299   :  { %v3014_v39 = vpop.f32.mrf.mxu1  ;;  %v3013_v21 = vadd.f32 %v3012_v13, %v2972_v37  ;;  %v2974_v24 = vadd.f32 %v2973_v38, %v2933_v36 }
 0x29a   :  { %v2975_v40 = vpop.f32.mrf.mxu0 }
 0x29b   :  { %v3016_v41 = vpop.f32.mrf.mxu1  ;;  %v3015_v42 = vadd.f32 %v3014_v39, %v2974_v24  ;;  %v3019_v43 = vmax.f32 %v3013_v21, 0.0 }
 0x29c   :  { %v2976_v44 = vpop.f32.mrf.mxu0 }
 0x29d   :  { %v3017_v45 = vpop.f32.mrf.mxu1  ;;  %v3020_v46 = vmax.f32 %v3015_v42, 0.0  ;;  %v3021_v48 = vpack.c.bf16 %v3019_v43, %v3019_v43 }
 0x29f   :  { %v3022_v47 = vpack.c.bf16 %v3020_v46, %v3020_v46 }
 0x2a1   :  { %3259 = vmatprep.mubr.bf16.mxu0 %v3022_v47 }
 0x2a2   :  { %3260 = vmatmul.mubr.bf16.vlgmr.msra.gmra.mxu0 %v3021_v48 }
 0x362   :  { %v3261_v60 = vpop.f32.mrf.mxu0 }
 0x363   :  { %v3262_v61 = vadd.f32 %v3261_v60, %v3060_v55 }
 0x364   :  { %v3263_v62 = vpop.f32.mrf.mxu0 }
 0x365   :  { %v3264_v63 = vadd.f32 %v3263_v62, %v3064_v56  ;;  %v3268_v0 = vmax.f32 %v3262_v61, 0.0 }
 0x366   :  { %v3265_v34 = vpop.f32.mrf.mxu0 }
 0x367   :  { %v3269_v1 = vmax.f32 %v3264_v63, 0.0  ;;  %v3270_v3 = vpack.c.bf16 %v3268_v0, %v3268_v0 }
 0x368   :  { %v3266_v35 = vpop.f32.mrf.mxu0 }
 0x369   :  { %v3271_v2 = vpack.c.bf16 %v3269_v1, %v3269_v1 }
 0x36b   :  { %3439 = vmatprep.mubr.bf16.mxu1 %v3271_v2 }
 0x36c   :  { %3440 = vmatmul.mubr.bf16.vlgmr.msra.gmra.mxu1 %v3270_v3 }
 0x42c   :  { %v3939_v4 = vpop.f32.mrf.mxu1 }
 0x42e   :  { %v3940_v6 = vpop.f32.mrf.mxu1 }
 0x42f   :  { %v3941_v29 = vadd.f32 %v3940_v6, %v3939_v4 }
 0x430   :  { %v3942_v23 = vpop.f32.mrf.mxu1 }
 0x431   :  { %v3442_v31 = vadd.f32 %v3941_v29, %v3906_v5 }
 0x432   :  { %v3943_v7 = vpop.f32.mrf.mxu1 }
 0x433   :  { %3447 = vst [vmem:[#allocation14] sm:$0xff] %v3442_v31 }
 0x434   :  { %4772 = shalt.err (!%p4769_p11)
}
 0x435   :  { %3457 = dma.vmem_to_hbm [thread:$0]  %s3455_s6, 128, %s4964_s7, [#allocation4]  }
 0x436   :  { %4789 = dma.done.wait [#allocation4], 128  }
 0x437   :  { %4790 = vsyncadd [#allocation4], 4294967168 }
 0x438   :  { %3461 = vsyncpa [#allocation3], 1 }
 0x439   :  { %3462 = vsyncpa [#allocation6], 1 }
 0x43a   :  { %3463 = vsyncpa [#allocation9], 1 }
 0x43b   :  { %3464 = vsyncpa [#allocation12], 1 }
 0x43c   :  { %3465 = vsyncpa [#allocation4], 1 }

</bundles_post_ra>
